<compile_context>
chip_gen: v7x
topology: tpu7x:2x2x1
jax: 0.10.0
libtpu: 0.0.40
codegen_flags: <defaults>
</compile_context>

<pallas_src>
import functools

import jax
import jax.numpy as jnp
from jax import lax
from jax.experimental import pallas as pl
from jax.experimental.pallas import tpu as pltpu


def _round_up(x, m):
    return ((x + m - 1) // m) * m


@functools.lru_cache(maxsize=None)
def _vmem_capacity_bytes():
    """Physical VMEM per core; conservative (v7x-sized) fallback if unknown."""
    try:
        cap = getattr(pltpu.get_tpu_info(), "vmem_capacity_bytes", None)
        if cap:
            return int(cap)
    except Exception:
        pass
    return 64 * 1024 * 1024


def _pick_tile(extent, cap, unit, require_divisor=False):
    """Largest tile <= cap (multiple of `unit`) for a `unit`-aligned extent.

    Prefers exact divisors of `extent` (zero padding waste); with
    require_divisor=False, falls back to `cap` + padding when the largest
    divisor would be pathologically small.
    """
    cap = max(unit, (cap // unit) * unit)
    if extent <= cap:
        return extent
    t = cap
    while t >= unit:
        if extent % t == 0:
            if require_divisor or 2 * t >= cap:
                return t
            break
        t -= unit
    return cap


def _apply_activation(y, act):
    """y: f32 tile. act is a static Python string."""
    if act == "mish":
        # mish(y) = y * tanh(softplus(y)).
        # With t = exp(-|y|) (always in (0, 1], no overflow):
        #   y >= 0: tanh(log(1 + e^y)) = (2t + 1)   / (2t^2 + 2t + 1)
        #   y <  0: tanh(log(1 + e^y)) = (t^2 + 2t) / (t^2 + 2t + 2)
        # -> one EUP transcendental + one EUP approx reciprocal per element.
        t = jnp.exp(-jnp.abs(y))
        num = jnp.where(y >= 0, 2.0 * t + 1.0, t * t + 2.0 * t)
        den = jnp.where(y >= 0, 2.0 * t * t + 2.0 * t + 1.0, t * t + 2.0 * t + 2.0)
        return y * (num * pl.reciprocal(den, approx=True))
    if act == "relu":
        return jnp.maximum(y, 0.0)
    if act == "leaky":
        return jnp.where(y >= 0, y, 0.1 * y)
    return y  # linear


def _fused_gemm_kernel(lhs_ref, rhs_ref, bias_ref, o_ref, acc_ref, *,
                       act, tk, tn, rhs_resident):
    """One (tm, tn) output tile; grid axis 2 is the K reduction."""
    k = pl.program_id(2)

    @pl.when(k == 0)
    def _():
        acc_ref[...] = jnp.zeros_like(acc_ref)

    if rhs_resident:
        # Whole folded-weight matrix lives in VMEM; slice the (tk, tn) block.
        j = pl.program_id(1)
        rhs = rhs_ref[pl.ds(pl.multiple_of(k * tk, tk), tk),
                      pl.ds(pl.multiple_of(j * tn, tn), tn)]
    else:
        rhs = rhs_ref[...]

    acc_ref[...] += jnp.dot(lhs_ref[...], rhs, preferred_element_type=jnp.float32)

    @pl.when(k == pl.num_programs(2) - 1)
    def _():
        y = acc_ref[...] + bias_ref[...]          # (tm, tn) + (1, tn), f32
        o_ref[...] = _apply_activation(y, act).astype(o_ref.dtype)


def conv_bn_activation(
    x,
    weight,
    conv_bias=None,
    *,
    stride=1,
    activation="relu",
    bn_params=None,       # (gamma, beta, running_mean, running_var) or None
    eps=1e-5,
    data_format="NCHW",   # "NCHW" (PyTorch default) or "NHWC" (skips transposes)
):
    """Forward pass of Conv_Bn_Activation.

    x:      (N, Cin, H, W) if NCHW, (N, H, W, Cin) if NHWC.
    weight: (Cout, Cin, kH, kW)  — like PyTorch nn.Conv2d.
    """
    if activation not in ("mish", "relu", "leaky", "linear"):
        raise ValueError(f"unsupported activation: {activation}")

    if data_format == "NCHW":
        N, Cin, H, W = x.shape
        x_nhwc = jnp.transpose(x, (0, 2, 3, 1))
    elif data_format == "NHWC":
        N, H, W, Cin = x.shape
        x_nhwc = x
    else:
        raise ValueError(f"unsupported data_format: {data_format}")

    O, Cin_w, kH, kW = weight.shape
    assert Cin == Cin_w, "channel mismatch"
    # Square-kernel "same"-style padding, exactly as in the PyTorch module
    # (kernel_size there is a single int, so kH == kW).
    pad = (kH - 1) // 2
    Hout = (H + 2 * pad - kH) // stride + 1
    Wout = (W + 2 * pad - kW) // stride + 1

    out_dtype = x.dtype
    gemm_dtype = jnp.bfloat16  # bf16 MXU operands, f32 accumulation

    # ---- fold BatchNorm (inference) into conv weight / bias (f32) ----------
    w = weight.astype(jnp.float32)
    b = (conv_bias.astype(jnp.float32) if conv_bias is not None
         else jnp.zeros((O,), jnp.float32))
    if bn_params is not None:
        gamma, beta, mean, var = (p.astype(jnp.float32) for p in bn_params)
        scale = gamma * lax.rsqrt(var + eps)
        w = w * scale[:, None, None, None]
        b = (b - mean) * scale + beta

    # ---- im2col in bf16: K ordering = (dy, dx, cin), cin fastest ------------
    x_nhwc = x_nhwc.astype(gemm_dtype)
    x_padded = jnp.pad(x_nhwc, ((0, 0), (pad, pad), (pad, pad), (0, 0)))
    patches = []
    for dy in range(kH):
        for dx in range(kW):
            patches.append(
                x_padded[:, dy:dy + stride * Hout:stride,
                            dx:dx + stride * Wout:stride, :])
    lhs = jnp.concatenate(patches, axis=-1).reshape(N * Hout * Wout, kH * kW * Cin)
    # weight matrix with matching K ordering: (kH, kW, Cin, O) -> (K, O)
    rhs = jnp.transpose(w, (2, 3, 1, 0)).reshape(kH * kW * Cin, O).astype(gemm_dtype)

    M, Kd = lhs.shape

    # ---- generation-aware tile selection ------------------------------------
    vmem_cap = _vmem_capacity_bytes()
    if vmem_cap >= 100 * 1024 * 1024:      # 128-MiB-VMEM chips (v5e / v6e)
        cap_m, cap_n, cap_k = 2048, 512, 1024
    else:                                   # 64-MiB-VMEM chips (v7x) / unknown
        cap_m, cap_n, cap_k = 1024, 512, 512

    Mr = _round_up(M, 8)
    Np = _round_up(O, 128)
    Kp = _round_up(Kd, 128)

    tm = _pick_tile(Mr, cap_m, 8)
    tn = _pick_tile(Np, cap_n, 128, require_divisor=True)
    tk = _pick_tile(Kp, cap_k, 128, require_divisor=True)
    Mp = _round_up(M, tm)

    # v7x has 2 TensorCores sharing the "parallel" grid axes: make sure at
    # least one parallel axis has >= 2 blocks so neither core idles.
    while (Mp // tm) * (Np // tn) < 2 and tm > 256:
        tm = max(256, _round_up(tm // 2, 8))
        Mp = _round_up(M, tm)

    grid = (Mp // tm, Np // tn, Kp // tk)

    # Keep the folded weights resident in VMEM (single DMA, constant index_map)
    # when they fit a small budget; otherwise stream (tk, tn) blocks.
    rhs_resident = (Kp * Np * 2 * 2) <= (4 * 1024 * 1024)

    lhs_p = jnp.pad(lhs, ((0, Mp - M), (0, Kp - Kd)))
    rhs_p = jnp.pad(rhs, ((0, Kp - Kd), (0, Np - O)))
    bias_p = jnp.pad(b, (0, Np - O)).reshape(1, Np)

    if rhs_resident:
        rhs_spec = pl.BlockSpec((Kp, Np), lambda i, j, k: (0, 0))
    else:
        rhs_spec = pl.BlockSpec((tk, tn), lambda i, j, k: (k, j))

    # Scoped-VMEM budget: double-buffered lhs/rhs/bias/out blocks + f32 acc.
    out_itemsize = jnp.dtype(out_dtype).itemsize
    rhs_block_elems = (Kp * Np) if rhs_resident else (tk * tn)
    vmem_need = (2 * tm * tk * 2 + 2 * rhs_block_elems * 2 + 2 * tn * 4
                 + 2 * tm * tn * out_itemsize + tm * tn * 4)
    vmem_limit = min((vmem_cap * 9) // 10,
                     max(32 * 1024 * 1024, vmem_need + (16 << 20)))

    out_p = pl.pallas_call(
        functools.partial(_fused_gemm_kernel, act=activation, tk=tk, tn=tn,
                          rhs_resident=rhs_resident),
        out_shape=jax.ShapeDtypeStruct((Mp, Np), out_dtype),
        grid_spec=pltpu.PrefetchScalarGridSpec(
            num_scalar_prefetch=0,
            grid=grid,
            in_specs=[
                pl.BlockSpec((tm, tk), lambda i, j, k: (i, k)),   # im2col patches
                rhs_spec,                                         # folded weights
                pl.BlockSpec((1, tn), lambda i, j, k: (0, j)),    # folded bias
            ],
            out_specs=pl.BlockSpec((tm, tn), lambda i, j, k: (i, j)),
            scratch_shapes=[pltpu.VMEM((tm, tn), jnp.float32)],
        ),
        compiler_params=pltpu.CompilerParams(
            dimension_semantics=("parallel", "parallel", "arbitrary"),
            vmem_limit_bytes=int(vmem_limit),
        ),
    )(lhs_p, rhs_p, bias_p)

    out_nhwc = out_p[:M, :O].reshape(N, Hout, Wout, O)
    if data_format == "NCHW":
        return jnp.transpose(out_nhwc, (0, 3, 1, 2))
    return out_nhwc


# ------------------------- pure-JAX reference --------------------------------
def conv_bn_activation_reference(x, weight, conv_bias, stride, activation,
                                 bn_params, eps=1e-5):
    pad = (weight.shape[2] - 1) // 2
    y = lax.conv_general_dilated(
        x.astype(jnp.float32), weight.astype(jnp.float32),
        window_strides=(stride, stride),
        padding=[(pad, pad), (pad, pad)],
        dimension_numbers=("NCHW", "OIHW", "NCHW"),
        precision=lax.Precision.HIGHEST,
    )
    if conv_bias is not None:
        y = y + conv_bias.astype(jnp.float32)[None, :, None, None]
    if bn_params is not None:
        gamma, beta, mean, var = (p.astype(jnp.float32) for p in bn_params)
        s = (gamma * lax.rsqrt(var + eps))[None, :, None, None]
        y = (y - mean[None, :, None, None]) * s + beta[None, :, None, None]
    if activation == "mish":
        y = y * jnp.tanh(jax.nn.softplus(y))
    elif activation == "relu":
        y = jnp.maximum(y, 0.0)
    elif activation == "leaky":
        y = jnp.where(y >= 0, y, 0.1 * y)
    return y.astype(x.dtype)


if __name__ == "__main__":
    key = jax.random.PRNGKey(0)
    k1, k2, k3, k4, k5, k6, k7 = jax.random.split(key, 7)

    # Small shapes consistent with the module: batch=2, Cin=4, 16x16, 3x3 conv.
    N, Cin, H, W = 2, 4, 16, 16
    Cout, ksize = 8, 3

    x = jax.random.normal(k1, (N, Cin, H, W), dtype=jnp.float32) * 2.0
    weight = jax.random.normal(k2, (Cout, Cin, ksize, ksize), dtype=jnp.float32) * 0.2
    gamma = jax.random.uniform(k3, (Cout,), minval=0.5, maxval=1.5, dtype=jnp.float32)
    beta = jax.random.normal(k4, (Cout,), dtype=jnp.float32) * 0.1
    mean = jax.random.normal(k5, (Cout,), dtype=jnp.float32) * 0.1
    var = jax.random.uniform(k6, (Cout,), minval=0.5, maxval=1.5, dtype=jnp.float32)
    conv_bias = jax.random.normal(k7, (Cout,), dtype=jnp.float32) * 0.1
    bn_params = (gamma, beta, mean, var)

    # bf16 MXU operands vs an f32 HIGHEST-precision reference -> loose tolerance.
    ATOL, RTOL = 1e-1, 5e-2

    for act in ("mish", "relu", "leaky", "linear"):
        y = conv_bn_activation(x, weight, None, stride=1, activation=act,
                               bn_params=bn_params)
        jax.block_until_ready(y)
        y_ref = conv_bn_activation_reference(x, weight, None, 1, act, bn_params)
        assert y.shape == y_ref.shape and y.dtype == y_ref.dtype
        assert jnp.allclose(y, y_ref, atol=ATOL, rtol=RTOL), \
            f"mismatch vs reference for activation={act}"

    # stride=2, conv bias, no BN.
    y = conv_bn_activation(x, weight, conv_bias, stride=2, activation="leaky",
                           bn_params=None)
    jax.block_until_ready(y)
    y_ref = conv_bn_activation_reference(x, weight, conv_bias, 2, "leaky", None)
    assert y.shape == y_ref.shape
    assert jnp.allclose(y, y_ref, atol=ATOL, rtol=RTOL), "mismatch for stride=2"

    # NHWC fast path (skips the layout transposes) matches the NCHW result.
    y_nhwc = conv_bn_activation(jnp.transpose(x, (0, 2, 3, 1)), weight, None,
                                stride=1, activation="relu", bn_params=bn_params,
                                data_format="NHWC")
    jax.block_until_ready(y_nhwc)
    y_ref = conv_bn_activation_reference(x, weight, None, 1, "relu", bn_params)
    assert jnp.allclose(jnp.transpose(y_nhwc, (0, 3, 1, 2)), y_ref,
                        atol=ATOL, rtol=RTOL), "mismatch for NHWC path"

    print("KERNEL_OK")
</pallas_src>

<mosaic_0001>
module attributes {stable_mosaic.version = 11 : i64} {
  func.func @_fused_gemm_kernel(%arg0: i32, %arg1: i32, %arg2: i32, %arg3: memref<256x128xbf16, #tpu.memory_space<vmem>>, %arg4: memref<128x128xbf16, #tpu.memory_space<vmem>>, %arg5: memref<1x128xf32, #tpu.memory_space<vmem>>, %arg6: memref<256x128xf32, #tpu.memory_space<vmem>>, %arg7: memref<256x128xf32, #tpu.memory_space<vmem>>) attributes {dimension_semantics = [#tpu.dimension_semantics<parallel>, #tpu.dimension_semantics<parallel>, #tpu.dimension_semantics<arbitrary>], iteration_bounds = array<i64: 2, 1, 1>, scalar_prefetch = 0 : i64, scratch_operands = 1 : i64, tpu.core_type = #tpu.core_type<tc>, window_params = [{transform_indices = @transform_0, window_bounds = array<i64: 256, 128>}, {pipeline_mode = #tpu.pipeline_mode<synchronous>, transform_indices = @transform_1, window_bounds = array<i64: 128, 128>}, {transform_indices = @transform_2, window_bounds = array<i64: 1, 128>}, {transform_indices = @transform_3, window_bounds = array<i64: 256, 128>}]} {
    %c0_i32 = arith.constant 0 : i32
    %0 = arith.cmpi eq, %arg2, %c0_i32 : i32
    %1 = arith.extui %0 : i1 to i32
    %c0_i32_0 = arith.constant 0 : i32
    %2 = arith.cmpi ne, %1, %c0_i32_0 : i32
    scf.if %2 {
      %cst_9 = arith.constant 0.000000e+00 : f32
      %18 = vector.broadcast %cst_9 : f32 to vector<256x128xf32>
      %c0_10 = arith.constant 0 : index
      %c0_11 = arith.constant 0 : index
      %19 = vector.load %arg7[%c0_10, %c0_11] : memref<256x128xf32, #tpu.memory_space<vmem>>, vector<256x128xf32>
      tpu.vector_store %arg7[%c0_10, %c0_11], %18 {strides = array<i32>} : memref<256x128xf32, #tpu.memory_space<vmem>>, vector<256x128xf32>,
    } else {
    }
    %c128_i32 = arith.constant 128 : i32
    %3 = arith.muli %arg2, %c128_i32 : i32
    %4 = tpu.assume_multiple %3, 128 : i32
    %c128_i32_1 = arith.constant 128 : i32
    %5 = arith.muli %arg1, %c128_i32_1 : i32
    %6 = tpu.assume_multiple %5, 128 : i32
    %7 = arith.index_cast %4 : i32 to index
    %8 = arith.index_cast %6 : i32 to index
    %9 = vector.load %arg4[%7, %8] : memref<128x128xbf16, #tpu.memory_space<vmem>>, vector<128x128xbf16>
    %c0 = arith.constant 0 : index
    %c0_2 = arith.constant 0 : index
    %10 = vector.load %arg7[%c0, %c0_2] : memref<256x128xf32, #tpu.memory_space<vmem>>, vector<256x128xf32>
    %c0_3 = arith.constant 0 : index
    %c0_4 = arith.constant 0 : index
    %11 = vector.load %arg3[%c0_3, %c0_4] : memref<256x128xbf16, #tpu.memory_space<vmem>>, vector<256x128xbf16>
    %cst = arith.constant dense<0.000000e+00> : vector<256x128xf32>
    %12 = tpu.matmul %11, %9, %cst {dimension_numbers = #tpu.dot_dimension_numbers<[1], [0], [0], [1], [0, 0, 1, 1], [], []>} : vector<256x128xbf16>, vector<128x128xbf16>, vector<256x128xf32> -> vector<256x128xf32>
    %13 = arith.addf %10, %12 : vector<256x128xf32>
    %c0_5 = arith.constant 0 : index
    %c0_6 = arith.constant 0 : index
    %14 = vector.load %arg7[%c0_5, %c0_6] : memref<256x128xf32, #tpu.memory_space<vmem>>, vector<256x128xf32>
    tpu.vector_store %arg7[%c0_5, %c0_6], %13 {strides = array<i32>} : memref<256x128xf32, #tpu.memory_space<vmem>>, vector<256x128xf32>,
    %c0_i32_7 = arith.constant 0 : i32
    %15 = arith.cmpi eq, %arg2, %c0_i32_7 : i32
    %16 = arith.extui %15 : i1 to i32
    %c0_i32_8 = arith.constant 0 : i32
    %17 = arith.cmpi ne, %16, %c0_i32_8 : i32
    scf.if %17 {
      %c0_9 = arith.constant 0 : index
      %c0_10 = arith.constant 0 : index
      %18 = vector.load %arg7[%c0_9, %c0_10] : memref<256x128xf32, #tpu.memory_space<vmem>>, vector<256x128xf32>
      %c0_11 = arith.constant 0 : index
      %c0_12 = arith.constant 0 : index
      %19 = vector.load %arg5[%c0_11, %c0_12] : memref<1x128xf32, #tpu.memory_space<vmem>>, vector<1x128xf32>
      %20 = vector.broadcast %19 : vector<1x128xf32> to vector<256x128xf32>
      %21 = arith.addf %18, %20 : vector<256x128xf32>
      %22 = math.absf %21 : vector<256x128xf32>
      %cst_13 = arith.constant 0.000000e+00 : f32
      %23 = vector.broadcast %cst_13 : f32 to vector<256x128xf32>
      %24 = arith.subf %23, %22 : vector<256x128xf32>
      %25 = math.exp %24 : vector<256x128xf32>
      %cst_14 = arith.constant 0.000000e+00 : f32
      %26 = vector.broadcast %cst_14 : f32 to vector<256x128xf32>
      %27 = arith.cmpf oge, %21, %26 : vector<256x128xf32>
      %cst_15 = arith.constant 2.000000e+00 : f32
      %28 = vector.broadcast %cst_15 : f32 to vector<256x128xf32>
      %29 = arith.mulf %28, %25 : vector<256x128xf32>
      %cst_16 = arith.constant 1.000000e+00 : f32
      %30 = vector.broadcast %cst_16 : f32 to vector<256x128xf32>
      %31 = arith.addf %29, %30 : vector<256x128xf32>
      %32 = arith.mulf %25, %25 : vector<256x128xf32>
      %cst_17 = arith.constant 2.000000e+00 : f32
      %33 = vector.broadcast %cst_17 : f32 to vector<256x128xf32>
      %34 = arith.mulf %33, %25 : vector<256x128xf32>
      %35 = arith.addf %32, %34 : vector<256x128xf32>
      %36 = arith.select %27, %31, %35 : vector<256x128xi1>, vector<256x128xf32>
      %cst_18 = arith.constant 0.000000e+00 : f32
      %37 = vector.broadcast %cst_18 : f32 to vector<256x128xf32>
      %38 = arith.cmpf oge, %21, %37 : vector<256x128xf32>
      %cst_19 = arith.constant 2.000000e+00 : f32
      %39 = vector.broadcast %cst_19 : f32 to vector<256x128xf32>
      %40 = arith.mulf %39, %25 : vector<256x128xf32>
      %41 = arith.mulf %40, %25 : vector<256x128xf32>
      %cst_20 = arith.constant 2.000000e+00 : f32
      %42 = vector.broadcast %cst_20 : f32 to vector<256x128xf32>
      %43 = arith.mulf %42, %25 : vector<256x128xf32>
      %44 = arith.addf %41, %43 : vector<256x128xf32>
      %cst_21 = arith.constant 1.000000e+00 : f32
      %45 = vector.broadcast %cst_21 : f32 to vector<256x128xf32>
      %46 = arith.addf %44, %45 : vector<256x128xf32>
      %47 = arith.mulf %25, %25 : vector<256x128xf32>
      %cst_22 = arith.constant 2.000000e+00 : f32
      %48 = vector.broadcast %cst_22 : f32 to vector<256x128xf32>
      %49 = arith.mulf %48, %25 : vector<256x128xf32>
      %50 = arith.addf %47, %49 : vector<256x128xf32>
      %cst_23 = arith.constant 2.000000e+00 : f32
      %51 = vector.broadcast %cst_23 : f32 to vector<256x128xf32>
      %52 = arith.addf %50, %51 : vector<256x128xf32>
      %53 = arith.select %38, %46, %52 : vector<256x128xi1>, vector<256x128xf32>
      %54 = tpu.reciprocal %53 {approx = true} : vector<256x128xf32> -> vector<256x128xf32>
      %55 = arith.mulf %36, %54 : vector<256x128xf32>
      %56 = arith.mulf %21, %55 : vector<256x128xf32>
      %c0_24 = arith.constant 0 : index
      %c0_25 = arith.constant 0 : index
      %57 = vector.load %arg6[%c0_24, %c0_25] : memref<256x128xf32, #tpu.memory_space<vmem>>, vector<256x128xf32>
      tpu.vector_store %arg6[%c0_24, %c0_25], %56 {strides = array<i32>} : memref<256x128xf32, #tpu.memory_space<vmem>>, vector<256x128xf32>,
    } else {
    }
    return
  }
  func.func @transform_0(%arg0: i32, %arg1: i32, %arg2: i32) -> (i32, i32) {
    %c0_i32 = arith.constant 0 : i32
    return %arg0, %arg2 : i32, i32
  }
  func.func @transform_1(%arg0: i32, %arg1: i32, %arg2: i32) -> (i32, i32) {
    %c0_i32 = arith.constant 0 : i32
    %c0_i32_0 = arith.constant 0 : i32
    %c0_i32_1 = arith.constant 0 : i32
    return %c0_i32, %c0_i32_0 : i32, i32
  }
  func.func @transform_2(%arg0: i32, %arg1: i32, %arg2: i32) -> (i32, i32) {
    %c0_i32 = arith.constant 0 : i32
    %c0_i32_0 = arith.constant 0 : i32
    return %c0_i32, %arg1 : i32, i32
  }
  func.func @transform_3(%arg0: i32, %arg1: i32, %arg2: i32) -> (i32, i32) {
    %c0_i32 = arith.constant 0 : i32
    return %arg0, %arg1 : i32, i32
  }
}

</mosaic_0001>

<bundles_post_ra>
// kernel: tpu_custom_call.1
= control target key start
LH: loop header
LB: loop body
LE: loop exit
PB: predicated region body
PF: predicated region fallthrough
CT: control target
= control target key end

     0   :  { %8 = vsyncpa [#allocation4], 0  ;;  %s2876_s0 = inlined_call_operand.hbm [shape: bf16[512,128], index: 0, kind: input, shape index: {}]   ;;  %s2877_s1 = inlined_call_operand.hbm [shape: bf16[128,128], index: 1, kind: input, shape index: {}]   ;;  %s2878_s2 = inlined_call_operand.vmem [shape: f32[1,128], index: 2, kind: input, shape index: {}]   ;;  %s2879_s3 = inlined_call_operand.hbm [shape: f32[512,128], index: 3, kind: output, shape index: {}]  }
   0x1   :  { %10 = vsyncpa [#allocation4 + $0x1], 0 }
   0x2   :  { %11 = vsyncpa [#allocation7], 0 }
   0x3   :  { %12 = vsyncpa [#allocation5], 0 }
   0x4   :  { %14 = vsyncpa [#allocation5 + $0x1], 0  ;;  %s2085_s12 = smov 0   ;;  %s2087_s13 = smov 0  }
   0x5   :  { %s2089_s14 = smov 0   ;;  %s2091_s15 = smov 0  }
   0x6   :  { %s2093_s16 = smov 0   ;;  %s2095_s17 = smov 0  }
   0x7 LB: > { %s1549_s18 = sadd.s32 4294967295, %s2056_s17   ;;  %s1550_s19 = sadd.s32 4294967294, %s2056_s17   ;;  %s2056_s17 = sphi %s2095_s17, %s20_s17   ;;  %s2052_s16 = sphi %s2093_s16, %s2909_s16   ;;  %s2048_s15 = sphi %s2091_s15, %s2908_s15   ;;  %s2044_s14 = sphi %s2089_s14, %s2907_s14   ;;  %s2040_s13 = sphi %s2087_s13, %s2906_s13   ;;  %s2036_s12 = sphi %s2085_s12, %s2905_s12  }
   0x8   : > { %p61_p0 = scmp.ne.s32.totalorder %s2040_s13, %s2036_s12  ;;  %p2119_p1 = scmp.eq.s32.totalorder %s1549_s18, 0 }
   0x9   : > { %p2123_p2 = scmp.eq.s32.totalorder %s1549_s18, 1  ;;  %p140_p3 = scmp.eq.s32.totalorder %s1550_s19, 1 }
   0xa   : > { %s2884_s20 = scalar_select %p2119_p1, 1, 0 }
   0xb   : > { %s2885_s21 = scalar_select %p2123_p2, 1, 0 }
   0xc   : > { %p2129_p4 = por %p2119_p1, %p61_p0  ;;  %p1551_p5 = scmp.ge.s32.totalorder %s2056_s17, 1 }
   0xd   : > { %p2134_p6 = por %p140_p3, %p61_p0  ;;  %p147_p7 = scmp.lt.s32.totalorder %s2056_s17, 3 }
   0xe   : > { %s2886_s22 = scalar_select %p2129_p4, 1, 0 }
   0xf   : > { %s2887_s23 = scalar_select %p2134_p6, 1, 0 }
  0x10   : > { %p2139_p8 = pnand %p1551_p5, %p147_p7  ;;  %s2058_s25 = smov [#allocation6]  }
  0x11   : > { %s159_s26 = sshll.u32 %s2058_s25, 4  ;;  %s39_s28 = sadd.s32 1, %s2052_s16  ;;  %s160_s26 = int_to_ptr.vmem [resolvable:$true] %s159_s26 }
  0x12   : > { %s2888_s24 = scalar_select %p2139_p8, 1, 0 }
  0x13   : > { %p1690_p9 = pneg %p2139_p8  ;;  %s1912_s4 = scalar_lea.hbm %s2877_s1, 1024 }
  0x14   : > { %p1913_p12 = scmp.ne.s32.totalorder %s2877_s1, %s1912_s4  ;;  %p1919_p5 = scmp.lt.u32.totalorder %s1912_s4, %s2877_s1 }
  0x15   : > { %p2148_p11 = pnand %p1690_p9, %p2119_p1 }
  0x17   : > { %p1914_p13 = pneg %p2148_p11 }
  0x19   : > { %p1915_p0 = pnand %p1914_p13, %p1913_p12 }
  0x1b   : > { %p1916_p3 = pneg %p1915_p0 }
  0x1d   : > { %p1921_p7 = pnand %p1919_p5, %p1916_p3 }
  0x1f   : > { %1924 = shalt.err (!%p1921_p7)
}
  0x20   : > { %s1925_s9 = scalar_lea.vmem %s160_s26, 1024  ;;  %p1933_p1 = scmp.lt.s32.totalorder %s160_s26, %s160_s26 }
  0x21   : > { %p1926_p9 = scmp.ne.s32.totalorder %s160_s26, %s1925_s9  ;;  %p1934_p4 = scmp.lt.s32.totalorder %s1925_s9, %s1925_s9 }
  0x23   : > { %p1928_p10 = pnand %p1926_p9, %p1914_p13  ;;  %p1935_p8 = por %p1934_p4, %p1933_p1 }
  0x25   : > { %p1929_p6 = pneg %p1928_p10 }
  0x27   : > { %p1936_p2 = pnand %p1935_p8, %p1929_p6 }
  0x29   : > { %1939 = shalt.err (!%p1936_p2)
}
  0x2a   : > { %s2059_s10 = smov 64   ;;  %s2060_s11 = smov 4  }
  0x2b   : > { %1693 = dma.hbm_to_vmem [thread:$0]  (!%p2148_p11), %s2877_s1, 1024, %s160_s26, [#allocation7], %s2059_s10, %s2059_s10, %s2060_s11  }
  0x2c   : > { %p41_p1 = scmp.ge.s32.totalorder %s39_s28, 2  ;;  %s48_s25 = sadd.s32 1, %s2044_s14 }
  0x2d   : > { %p55_p2 = scmp.ne.s32.totalorder %s2044_s14, %s2040_s13  ;;  %p56_p4 = scmp.eq.s32.totalorder %s2056_s17, 0 }
  0x2e   : > { %s2911_s28 = smov (%p41_p1, %s39_s28), 0  ;;  %p2891_p8 = scmp.ne.s32.totalorder %s2885_s21, 0 }
  0x2f   : > { %p2178_p6 = por %p56_p4, %p55_p2  ;;  %s43_s30 = ssub.s32 %s2052_s16, %s2911_s28 }
  0x30   : > { %p2184_p10 = por %p2891_p8, %p55_p2  ;;  %p1703_p12 = scmp.lt.s32.totalorder %s2056_s17, 2 }
  0x31   : > { %p46_p11 = scmp.eq.s32.totalorder %s43_s30, 0  ;;  %s179_s26 = sand.u32 1, %s2044_s14  }
  0x32   : > { %s1555_s4 = sshll.u32 %s179_s26, 7  ;;  %s1592_s6 = sshll.u32 %s2052_s16, 11 }
  0x33   : > { %s2193_s5 = scalar_select %p46_p11, %s2044_s14, %s48_s25  }
  0x34   : > { %s2199_s9 = scalar_lea.hbm %s2876_s0, %s1592_s6  ;;  %s183_s21 = scalar_lea.vmem [#allocation3], %s1555_s4 }
  0x35   : > { %s191_s18 = sshll.u32 %s183_s21, 4  ;;  %p2205_p13 = pnand %p1703_p12, %p2178_p6  ;;  %s2201_s18 = int_to_ptr.vmem [resolvable:$true] %s191_s18 }
  0x36   : > { %s2209_s25 = scalar_lea.sflag [#allocation4], %s179_s26  ;;  %s1940_s30 = scalar_lea.hbm %s2199_s9, 2048 }
  0x37   : > { %p1941_p0 = scmp.ne.s32.totalorder %s2199_s9, %s1940_s30  ;;  %p1942_p3 = pneg %p2205_p13 }
  0x38   : > { %s1945_s29 = scalar_lea.hbm %s2876_s0, 4096  ;;  %p1946_p9 = scmp.lt.u32.totalorder %s2199_s9, %s2876_s0 }
  0x39   : > { %p1943_p5 = pnand %p1942_p3, %p1941_p0  ;;  %p1947_p1 = scmp.lt.u32.totalorder %s1945_s29, %s1940_s30 }
  0x3a   : > { %p1949_p4 = scmp.lt.u32.totalorder %s1940_s30, %s2199_s9 }
  0x3b   : > { %p1944_p7 = pneg %p1943_p5  ;;  %p1948_p2 = por %p1947_p1, %p1946_p9 }
  0x3d   : > { %p1950_p6 = por %p1949_p4, %p1948_p2 }
  0x3f   : > { %p1951_p8 = pnand %p1950_p6, %p1944_p7 }
  0x41   : > { %1954 = shalt.err (!%p1951_p8)
}
  0x42   : > { %s1955_s26 = scalar_lea.vmem %s2201_s18, 2048  ;;  %s2061_s21 = smov [#allocation3]  }
  0x43   : > { %p1956_p12 = scmp.ne.s32.totalorder %s2201_s18, %s1955_s26  ;;  %s1960_s4 = sshll.u32 %s2061_s21, 4  ;;  %s1961_s4 = int_to_ptr.vmem [resolvable:$false] %s1960_s4 }
  0x44   : > { %s1962_s6 = scalar_lea.vmem %s1961_s4, 4096  ;;  %p1963_p5 = scmp.lt.s32.totalorder %s2201_s18, %s1961_s4 }
  0x45   : > { %p1958_p11 = pnand %p1956_p12, %p1942_p3  ;;  %p1964_p9 = scmp.lt.s32.totalorder %s1962_s6, %s1955_s26 }
  0x47   : > { %p1959_p0 = pneg %p1958_p11  ;;  %p1965_p1 = por %p1964_p9, %p1963_p5 }
  0x49   : > { %p1966_p2 = pnand %p1965_p1, %p1959_p0 }
  0x4b   : > { %1969 = shalt.err (!%p1966_p2)
}
  0x4c   : > { %1697 = dma.hbm_to_vmem [thread:$0]  (!%p2205_p13), %s2199_s9, 2048, %s2201_s18, %s2209_s25, %s2059_s10, %s2059_s10, %s2060_s11  }
  0x4d   : > { %p2894_p3 = scmp.ne.s32.totalorder %s2888_s24, 0 }
  0x4f   : > { %203 = sbr.rel (%p2894_p3) target bundleno = 522 (0x20a), region = 32 }
  0x56   : > { %s2243_s30 = sand.u32 1, %s2040_s13   ;;  %p2895_p7 = scmp.ne.s32.totalorder %s2886_s22, 0 }
  0x57   : > { %s1559_s29 = sshll.u32 %s2243_s30, 7  ;;  %s206_s7 = scalar_lea.sflag [#allocation4], %s2243_s30 }
  0x58   : > { %s2247_s8 = scalar_lea.vmem [#allocation3], %s1559_s29 }
  0x59   : > { %2023 = dma.done.wait (%p2895_p7), %s206_s7, 2048  }
  0x5a   : > { %2025 = vsyncadd (%p2895_p7), %s206_s7, 4294965248  ;;  %p2896_p13 = scmp.ne.s32.totalorder %s2884_s20, 0 }
  0x5c   : > { %2027 = dma.done.wait (%p2896_p13), [#allocation7], 1024  }
  0x5d   : > { %2029 = vsyncadd (%p2896_p13), [#allocation7], 4294966272  ;;  %v1759_v0 = vld [vmem:[#allocation6] sm:$0xff]   ;;  %v1760_v1 = vld [vmem:[#allocation6 + $0x8] sm:$0xff]   ;;  %s1561_s24 = sshll.u32 %s2243_s30, 8  ;;  %s1593_s18 = sshll.u32 %s2048_s15, 12 }
  0x5e   : > { %1618 = vmatprep.subr.bf16.mxu0 %v1759_v0  ;;  %1666 = vmatprep.subr.bf16.mxu1 %v1759_v0  ;;  %v1761_v2 = vld [vmem:[#allocation6 + $0x10] sm:$0xff]   ;;  %v1762_v3 = vld [vmem:[#allocation6 + $0x18] sm:$0xff]   ;;  %v1767_v4 = vld [vmem:[%s2247_s8] sm:$0xff]   ;;  %s2444_s10 = scalar_lea.vmem [#allocation8], %s1561_s24  ;;  %s2823_s21 = scalar_lea.hbm %s2879_s3, %s1593_s18 }
  0x5f   : > { %1619 = vmatpush3.bf16.msra.mxu0 %v1759_v0  ;;  %1674 = vmatpush3.bf16.msra.mxu1 %v1759_v0  ;;  %v1768_v5 = vld [vmem:[%s2247_s8 + $0x40] sm:$0xff]   ;;  %v1764_v7 = vld [vmem:[#allocation6 + $0x28] sm:$0xff]   ;;  %v1765_v8 = vld [vmem:[#allocation6 + $0x30] sm:$0xff]   ;;  %s1436_s19 = sshll.u32 %s2444_s10, 4  ;;  %s1422_s15 = scalar_lea.sflag [#allocation5], %s2243_s30  ;;  %s2825_s19 = int_to_ptr.vmem [resolvable:$true] %s1436_s19 }
  0x60   : > { %1620 = vmatprep.subr.bf16.mxu0 %v1760_v1  ;;  %1667 = vmatprep.subr.bf16.mxu1 %v1760_v1  ;;  %v1763_v6 = vld [vmem:[#allocation6 + $0x20] sm:$0xff]   ;;  %v1766_v9 = vld [vmem:[#allocation6 + $0x38] sm:$0xff]   ;;  %v1769_v10 = vld [vmem:[%s2247_s8 + $0x8] sm:$0xff]   ;;  %s1970_s4 = scalar_lea.vmem %s2825_s19, 4096  ;;  %s2062_s6 = smov [#allocation8]  }
  0x61   : > { %1634 = vmatprep.mubr.bf16.mxu0 %v1767_v4  ;;  %1650 = vmatprep.mubr.bf16.mxu1 %v1768_v5  ;;  %v1770_v11 = vld [vmem:[%s2247_s8 + $0x48] sm:$0xff]   ;;  %v1771_v12 = vld [vmem:[%s2247_s8 + $0x10] sm:$0xff]   ;;  %v1773_v14 = vld [vmem:[%s2247_s8 + $0x18] sm:$0xff]   ;;  %p1971_p4 = scmp.ne.s32.totalorder %s2825_s19, %s1970_s4  ;;  %s1974_s29 = sshll.u32 %s2062_s6, 4  ;;  %s1975_s29 = int_to_ptr.vmem [resolvable:$false] %s1974_s29 }
  0x62   : > { %v1772_v13 = vld [vmem:[%s2247_s8 + $0x50] sm:$0xff]   ;;  %v1774_v15 = vld [vmem:[%s2247_s8 + $0x58] sm:$0xff]   ;;  %v1775_v16 = vld [vmem:[%s2247_s8 + $0x20] sm:$0xff]   ;;  %s1976_s7 = scalar_lea.vmem %s1975_s29, 8192  ;;  %p1977_p12 = scmp.lt.s32.totalorder %s2825_s19, %s1975_s29 }
  0x63   : > { %1621 = vmatpush3.bf16.msra.mxu0 %v1760_v1  ;;  %1675 = vmatpush3.bf16.msra.mxu1 %v1760_v1  ;;  %v1776_v17 = vld [vmem:[%s2247_s8 + $0x60] sm:$0xff]   ;;  %v1777_v18 = vld [vmem:[%s2247_s8 + $0x28] sm:$0xff]   ;;  %v1779_v20 = vld [vmem:[%s2247_s8 + $0x30] sm:$0xff]   ;;  %p1972_p6 = pnand %p1971_p4, %p2184_p10  ;;  %p1978_p11 = scmp.lt.s32.totalorder %s1976_s7, %s1970_s4 }
  0x64   : > { %1622 = vmatprep.subr.bf16.mxu0 %v1761_v2  ;;  %1668 = vmatprep.subr.bf16.mxu1 %v1761_v2  ;;  %v1778_v19 = vld [vmem:[%s2247_s8 + $0x68] sm:$0xff]   ;;  %v1780_v21 = vld [vmem:[%s2247_s8 + $0x70] sm:$0xff]   ;;  %v1781_v22 = vld [vmem:[%s2247_s8 + $0x38] sm:$0xff]  }
  0x65   : > { %v1782_v23 = vld [vmem:[%s2247_s8 + $0x78] sm:$0xff]   ;;  %v2276_v24 = vld [vmem:[%s2878_s2] ss:$0 sm:$0xff]  ;;  %p1973_p8 = pneg %p1972_p6  ;;  %p1979_p0 = por %p1978_p11, %p1977_p12 }
  0x67   : > { %1623 = vmatpush3.bf16.msra.mxu0 %v1761_v2  ;;  %1676 = vmatpush3.bf16.msra.mxu1 %v1761_v2  ;;  %p1980_p5 = pnand %p1979_p0, %p1973_p8 }
  0x68   : > { %1624 = vmatprep.subr.bf16.mxu0 %v1762_v3  ;;  %1669 = vmatprep.subr.bf16.mxu1 %v1762_v3 }
  0x6b   : > { %1625 = vmatpush3.bf16.msra.mxu0 %v1762_v3  ;;  %1677 = vmatpush3.bf16.msra.mxu1 %v1762_v3 }
  0x6c   : > { %1626 = vmatprep.subr.bf16.mxu0 %v1763_v6  ;;  %1670 = vmatprep.subr.bf16.mxu1 %v1763_v6 }
  0x6f   : > { %1627 = vmatpush3.bf16.msra.mxu0 %v1763_v6  ;;  %1678 = vmatpush3.bf16.msra.mxu1 %v1763_v6 }
  0x70   : > { %1628 = vmatprep.subr.bf16.mxu0 %v1764_v7  ;;  %1671 = vmatprep.subr.bf16.mxu1 %v1764_v7 }
  0x73   : > { %1629 = vmatpush3.bf16.msra.mxu0 %v1764_v7  ;;  %1679 = vmatpush3.bf16.msra.mxu1 %v1764_v7 }
  0x74   : > { %1630 = vmatprep.subr.bf16.mxu0 %v1765_v8  ;;  %1672 = vmatprep.subr.bf16.mxu1 %v1765_v8 }
  0x77   : > { %1631 = vmatpush3.bf16.msra.mxu0 %v1765_v8  ;;  %1680 = vmatpush3.bf16.msra.mxu1 %v1765_v8 }
  0x78   : > { %1632 = vmatprep.subr.bf16.mxu0 %v1766_v9  ;;  %1673 = vmatprep.subr.bf16.mxu1 %v1766_v9 }
  0x7b   : > { %1633 = vmatpush3.bf16.msra.mxu0 %v1766_v9  ;;  %1681 = vmatpush3.bf16.msra.mxu1 %v1766_v9 }
  0x7e   : > { %1635 = vmatmul.mubr.bf16.vlgmr.msra.gmra.mrb[0].mxu0 %v1769_v10  ;;  %1651 = vmatmul.mubr.bf16.vlgmr.msra.gmra.mrb[0].mxu1 %v1770_v11 }
  0x7f   : > { %1638 = vmatprep.mubr.bf16.mxu0 %v1771_v12  ;;  %1654 = vmatprep.mubr.bf16.mxu1 %v1772_v13 }
  0x86   : > { %1639 = vmatmul.mubr.bf16.gmra.mrb[4].mxu0 %v1773_v14  ;;  %1655 = vmatmul.mubr.bf16.gmra.mrb[4].mxu1 %v1774_v15 }
  0x87   : > { %1642 = vmatprep.mubr.bf16.mxu0 %v1775_v16  ;;  %1658 = vmatprep.mubr.bf16.mxu1 %v1776_v17 }
  0x8e   : > { %1643 = vmatmul.mubr.bf16.gmra.mrb[8].mxu0 %v1777_v18  ;;  %1659 = vmatmul.mubr.bf16.gmra.mrb[8].mxu1 %v1778_v19 }
  0x8f   : > { %1646 = vmatprep.mubr.bf16.mxu0 %v1779_v20  ;;  %1662 = vmatprep.mubr.bf16.mxu1 %v1780_v21 }
  0x96   : > { %1647 = vmatmul.mubr.bf16.gmra.mrb[12].mxu0 %v1781_v22  ;;  %1663 = vmatmul.mubr.bf16.gmra.mrb[12].mxu1 %v1782_v23 }
 0x151   : > { %v1636_v25 = vpop.f32.mrb[0].mxu0  ;;  %v1652_v26 = vpop.f32.mrb[0].mxu1 }
 0x152   : > { %v2279_v27 = vadd.f32 %v1636_v25, %v2276_v24  ;;  %v2282_v28 = vadd.f32 %v1652_v26, %v2276_v24  ;;  %v548_v29 = vpop.f32.mrb[1].mxu0  ;;  %v612_v30 = vpop.f32.mrb[1].mxu1 }
 0x153   : > { %v2285_v31 = vadd.f32 %v2276_v24, %v548_v29  ;;  %v2288_v32 = vadd.f32 %v2276_v24, %v612_v30  ;;  %v1637_v33 = vpop.f32.mrb[2].mxu0  ;;  %v1653_v34 = vpop.f32.mrb[2].mxu1 }
 0x154   : > { %v815_v35 = vand.u32 2147483647, %v2279_v27  ;;  %v831_v36 = vand.u32 2147483647, %v2282_v28  ;;  %v2295_v41 = vadd.f32 %v1637_v33, %v2276_v24  ;;  %v2298_v42 = vadd.f32 %v1653_v34, %v2276_v24  ;;  %v551_v43 = vpop.f32.mrb[3].mxu0  ;;  %v615_v44 = vpop.f32.mrb[3].mxu1 }
 0x155   : > { %v813_v37 = vand.u32 2147483647, %v2285_v31  ;;  %v829_v38 = vand.u32 2147483647, %v2288_v32  ;;  %v2301_v47 = vadd.f32 %v2276_v24, %v551_v43  ;;  %v2304_v48 = vadd.f32 %v2276_v24, %v615_v44 }
 0x156   : > { %v847_v39 = vsub.f32 0.0, %v815_v35  ;;  %v863_v40 = vsub.f32 0.0, %v831_v36  ;;  %v816_v51 = vand.u32 2147483647, %v2295_v41  ;;  %v832_v55 = vand.u32 2147483647, %v2298_v42 }
 0x157   : > { %v845_v45 = vsub.f32 0.0, %v813_v37  ;;  %v861_v46 = vsub.f32 0.0, %v829_v38  ;;  %v814_v56 = vand.u32 2147483647, %v2301_v47  ;;  %v830_v58 = vand.u32 2147483647, %v2304_v48 }
 0x158   : > { %v881_v49 = vmul.f32 1.442695, %v847_v39  ;;  %v913_v50 = vmul.f32 1.442695, %v863_v40  ;;  %v848_v54 = vsub.f32 0.0, %v816_v51  ;;  %v864_v62 = vsub.f32 0.0, %v832_v55 }
 0x159   : > { %v877_v52 = vmul.f32 1.442695, %v845_v45  ;;  %v909_v53 = vmul.f32 1.442695, %v861_v46  ;;  %v1640_v57 = vpop.f32.mrb[4].mxu0  ;;  %v1656_v59 = vpop.f32.mrb[4].mxu1 }
 0x15a   : > { %1783 = vpow2.f32 %v881_v49  ;;  %v564_v60 = vpop.f32.mrb[5].mxu0  ;;  %v883_v61 = vmul.f32 1.442695, %v848_v54  ;;  %v846_v63 = vsub.f32 0.0, %v814_v56  ;;  %v628_v0 = vpop.f32.mrb[5].mxu1  ;;  %v862_v2 = vsub.f32 0.0, %v830_v58 }
 0x15b   : > { %1785 = vpow2.f32 %v913_v50  ;;  %v1641_v1 = vpop.f32.mrb[6].mxu0  ;;  %v2311_v3 = vadd.f32 %v1640_v57, %v2276_v24  ;;  %v2314_v4 = vadd.f32 %v1656_v59, %v2276_v24  ;;  %v1657_v5 = vpop.f32.mrb[6].mxu1  ;;  %v2317_v7 = vadd.f32 %v2276_v24, %v564_v60 }
 0x15c   : > { %1787 = vpow2.f32 %v877_v52  ;;  %v567_v6 = vpop.f32.mrb[7].mxu0  ;;  %v2319_v8 = vpop.f32.mrb[7].mxu1  ;;  %v915_v9 = vmul.f32 1.442695, %v864_v62  ;;  %v879_v11 = vmul.f32 1.442695, %v846_v63  ;;  %v2325_v16 = vadd.f32 %v2276_v24, %v628_v0 }
 0x15d   : > { %1789 = vpow2.f32 %v909_v53  ;;  %v819_v10 = vand.u32 2147483647, %v2311_v3  ;;  %v835_v12 = vand.u32 2147483647, %v2314_v4  ;;  %v817_v13 = vand.u32 2147483647, %v2317_v7 }
 0x15e   : > { %1791 = vpow2.f32 %v883_v61  ;;  %v911_v14 = vmul.f32 1.442695, %v862_v2  ;;  %vm943_vm0 = vcmp.ge.f32.partialorder %v2279_v27, 0.0  ;;  %v2337_v26 = vadd.f32 %v1641_v1, %v2276_v24 }
 0x15f   : > { %v851_v15 = vsub.f32 0.0, %v819_v10  ;;  %v867_v19 = vsub.f32 0.0, %v835_v12  ;;  %1793 = vpow2.f32 %v915_v9  ;;  %v849_v22 = vsub.f32 0.0, %v817_v13 }
 0x160   : > { %1795 = vpow2.f32 %v879_v11  ;;  %vm959_vm1 = vcmp.ge.f32.partialorder %v2282_v28, 0.0  ;;  %v833_v34 = vand.u32 2147483647, %v2325_v16  ;;  %v2346_v43 = vadd.f32 %v1657_v5, %v2276_v24 }
 0x161   : > { %v2327_v17 = vpop.f32.mrb[8].mxu0  ;;  %v2329_v18 = vpop.f32.mrb[8].mxu1  ;;  %v889_v25 = vmul.f32 1.442695, %v851_v15  ;;  %1797 = vpow2.f32 %v911_v14  ;;  %v921_v40 = vmul.f32 1.442695, %v867_v19  ;;  %v2363_v60 = vadd.f32 %v2276_v24, %v567_v6 }
 0x162   : > { %v2331_v20 = vpop.f32.mrb[9].mxu0  ;;  %v2333_v21 = vpop.f32.mrb[9].mxu1  ;;  %v2354_v51 = vmul.f32 1.442695, %v849_v22  ;;  %vm941_vm2 = vcmp.ge.f32.partialorder %v2285_v31, 0.0  ;;  %v2360_v59 = vsub.f32 0.0, %v833_v34 }
 0x163   : > { %v2341_v35 = vpop.f32.mrb[10].mxu0  ;;  %v2343_v36 = vpop.f32.mrb[10].mxu1  ;;  %v820_v56 = vand.u32 2147483647, %v2337_v26  ;;  %1799 = vpow2.f32 %v889_v25  ;;  %vm957_vm3 = vcmp.ge.f32.partialorder %v2288_v32, 0.0  ;;  %vm944_vm4 = vcmp.ge.f32.partialorder %v2295_v41, 0.0 }
 0x164   : > { %v1784_v23 = vpop.eup %1783  ;;  %v2348_v44 = vpop.f32.mrb[11].mxu0  ;;  %1801 = vpow2.f32 %v921_v40  ;;  %vm960_vm5 = vcmp.ge.f32.partialorder %v2298_v42, 0.0  ;;  %vm942_vm6 = vcmp.ge.f32.partialorder %v2301_v47, 0.0  ;;  %vm958_vm7 = vcmp.ge.f32.partialorder %v2304_v48, 0.0 }
 0x165   : > { %v1786_v29 = vpop.eup %1785  ;;  %v975_v30 = vmul.f32 2.0, %v1784_v23  ;;  %v1039_v33 = vmul.f32 %v1784_v23, %v1784_v23  ;;  %v2350_v45 = vpop.f32.mrb[11].mxu1  ;;  %vm947_vm8 = vcmp.ge.f32.partialorder %v2311_v3, 0.0  ;;  %vm963_vm9 = vcmp.ge.f32.partialorder %v2314_v4, 0.0 }
 0x166   : > { %v1788_v37 = vpop.eup %1787  ;;  %v991_v38 = vmul.f32 2.0, %v1786_v29  ;;  %v1055_v39 = vmul.f32 %v1786_v29, %v1786_v29  ;;  %vm945_vm10 = vcmp.ge.f32.partialorder %v2317_v7, 0.0  ;;  %vm961_vm11 = vcmp.ge.f32.partialorder %v2325_v16, 0.0 }
 0x167   : > { %v2352_v46 = vadd.f32 %v1039_v33, %v975_v30  ;;  %v1135_v49 = vmul.f32 %v1784_v23, %v975_v30  ;;  %v973_v50 = vmul.f32 2.0, %v1788_v37  ;;  %v1790_v52 = vpop.eup %1789  ;;  %v1037_v55 = vmul.f32 %v1788_v37, %v1788_v37 }
 0x168   : > { %v2356_v53 = vadd.f32 %v1055_v39, %v991_v38  ;;  %v1151_v54 = vmul.f32 %v1786_v29, %v991_v38  ;;  %v1792_v57 = vpop.eup %1791  ;;  %v989_v11 = vmul.f32 2.0, %v1790_v52  ;;  %v1053_v6 = vmul.f32 %v1790_v52, %v1790_v52 }
 0x169   : > { %v1167_v58 = vadd.f32 %v1135_v49, %v975_v30  ;;  %v2365_v61 = vpop.f32.mrb[12].mxu0  ;;  %v2367_v62 = vpop.f32.mrb[12].mxu1  ;;  %v1231_v63 = vadd.f32 2.0, %v2352_v46  ;;  %v1069_v1 = vadd.f32 %v1037_v55, %v973_v50  ;;  %v1133_v10 = vmul.f32 %v1788_v37, %v973_v50 }
 0x16a   : > { %v1183_v0 = vadd.f32 %v1151_v54, %v991_v38  ;;  %v2370_v2 = vpop.f32.mrb[13].mxu0  ;;  %v2372_v5 = vpop.f32.mrb[13].mxu1  ;;  %v1007_v14 = vadd.f32 1.0, %v975_v30  ;;  %v1247_v19 = vadd.f32 2.0, %v2356_v53  ;;  %v976_v22 = vmul.f32 2.0, %v1792_v57 }
 0x16b   : > { %v1199_v9 = vadd.f32 1.0, %v1167_v58  ;;  %v2375_v12 = vpop.f32.mrb[14].mxu0  ;;  %v2377_v13 = vpop.f32.mrb[14].mxu1  ;;  %v1023_v34 = vadd.f32 1.0, %v991_v38  ;;  %v1165_v37 = vadd.f32 %v1133_v10, %v973_v50  ;;  %v1085_v39 = vadd.f32 %v1053_v6, %v989_v11 }
 0x16c   : > { %2897 = vst [vmem:[#allocation12_spill] sm:$0xff] %v2377_v13  ;;  %v1215_v15 = vadd.f32 1.0, %v1183_v0  ;;  %v2380_v23 = vpop.f32.mrb[15].mxu0  ;;  %v2382_v25 = vpop.f32.mrb[15].mxu1  ;;  %v1005_v49 = vadd.f32 1.0, %v973_v50  ;;  %v1149_v54 = vmul.f32 %v1790_v52, %v989_v11  ;;  %v1229_v0 = vadd.f32 2.0, %v1069_v1 }
 0x16d   : > { %2898 = vst [vmem:[#allocation13_spill] sm:$0xff] %v2380_v23  ;;  %2899 = vst [vmem:[#allocation14_spill] sm:$0xff] %v2382_v25  ;;  %v1794_v29 = vpop.eup %1793  ;;  %v1263_v33 = vsel %vm943_vm0, %v1199_v9, %v1231_v63  ;;  %v1197_v58 = vadd.f32 1.0, %v1165_v37  ;;  %v1245_v25 = vadd.f32 2.0, %v1085_v39  ;;  %v1040_v13 = vmul.f32 %v1792_v57, %v1792_v57 }
 0x16e   : > { %v1796_v40 = vpop.eup %1795  ;;  %1803 = vrcp.f32 %v1263_v33  ;;  %v1279_v30 = vsel %vm959_vm1, %v1215_v15, %v1247_v19  ;;  %v1181_v23 = vadd.f32 %v1149_v54, %v989_v11  ;;  %v1136_v63 = vmul.f32 %v1792_v57, %v976_v22 }
 0x16f   : > { %v1798_v55 = vpop.eup %1797  ;;  %1805 = vrcp.f32 %v1279_v30  ;;  %v992_v38 = vmul.f32 2.0, %v1794_v29  ;;  %v1261_v9 = vsel %vm941_vm2, %v1197_v58, %v1229_v0  ;;  %v1056_v10 = vmul.f32 %v1794_v29, %v1794_v29 }
 0x170   : > { %v2392_v6 = vmul.f32 2.0, %v1796_v40  ;;  %v1038_v15 = vmul.f32 %v1796_v40, %v1796_v40  ;;  %1807 = vrcp.f32 %v1261_v9  ;;  %v1213_v50 = vadd.f32 1.0, %v1181_v23  ;;  %v1800_v33 = vpop.eup %1799 }
 0x171   : > { %v2394_v52 = vadd.f32 %v1040_v13, %v976_v22  ;;  %v1168_v19 = vadd.f32 %v1136_v63, %v976_v22  ;;  %v1103_v57 = vsel %vm943_vm0, %v1007_v14, %v2352_v46  ;;  %v2399_v37 = vadd.f32 %v1056_v10, %v992_v38  ;;  %v1802_v58 = vpop.eup %1801 }
 0x172   : > { %v1152_v30 = vmul.f32 %v1794_v29, %v992_v38  ;;  %v2402_v54 = vsub.f32 0.0, %v820_v56  ;;  %v1021_v0 = vadd.f32 1.0, %v989_v11  ;;  %v1277_v13 = vsel %vm957_vm3, %v1213_v50, %v1245_v25 }
 0x173   : > { %v1200_v23 = vadd.f32 1.0, %v1168_v19  ;;  %v1232_v63 = vadd.f32 2.0, %v2394_v52  ;;  %v1119_v46 = vsel %vm959_vm1, %v1023_v34, %v2356_v53  ;;  %v1101_v14 = vsel %vm941_vm2, %v1005_v49, %v1069_v1 }
 0x174   : > { %1809 = vrcp.f32 %v1277_v13  ;;  %v1184_v29 = vadd.f32 %v1152_v30, %v992_v38  ;;  %v2415_v11 = vadd.f32 %v1038_v15, %v2392_v6  ;;  %v1134_v25 = vmul.f32 %v1796_v40, %v2392_v6 }
 0x175   : > { %v1264_v56 = vsel %vm944_vm4, %v1200_v23, %v1232_v63  ;;  %v2419_v9 = vmul.f32 2.0, %v1798_v55  ;;  %v1248_v34 = vadd.f32 2.0, %v2399_v37  ;;  %v1054_v1 = vmul.f32 %v1798_v55, %v1798_v55 }
 0x176   : > { %1811 = vrcp.f32 %v1264_v56  ;;  %v1216_v53 = vadd.f32 1.0, %v1184_v29  ;;  %v1117_v10 = vsel %vm957_vm3, %v1021_v0, %v1085_v39  ;;  %v1008_v50 = vadd.f32 1.0, %v976_v22 }
 0x177   : > { %v1166_v15 = vadd.f32 %v1134_v25, %v2392_v6  ;;  %v2426_v19 = vmul.f32 2.0, %v1800_v33  ;;  %v2431_v23 = vadd.f32 %v1054_v1, %v2419_v9  ;;  %v1150_v63 = vmul.f32 %v1798_v55, %v2419_v9 }
 0x178   : > { %v1804_v49 = vpop.eup %1803  ;;  %v1280_v13 = vsel %vm960_vm5, %v1216_v53, %v1248_v34  ;;  %v1230_v39 = vadd.f32 2.0, %v2415_v11  ;;  %v1024_v0 = vadd.f32 1.0, %v992_v38  ;;  %vm948_vm12 = vcmp.ge.f32.partialorder %v2337_v26, 0.0 }
 0x179   : > { %v1806_v40 = vpop.eup %1805  ;;  %v1327_v30 = vmul.f32 %v1804_v49, %v1103_v57  ;;  %1813 = vrcp.f32 %v1280_v13  ;;  %v1198_v56 = vadd.f32 1.0, %v1166_v15  ;;  %v1182_v57 = vadd.f32 %v1150_v63, %v2419_v9 }
 0x17a   : > { %v1343_v29 = vmul.f32 %v1806_v40, %v1119_v46  ;;  %v1246_v25 = vadd.f32 2.0, %v2431_v23  ;;  %v1808_v53 = vpop.eup %1807  ;;  %v1043_v46 = vmul.f32 %v1800_v33, %v1800_v33  ;;  %v1139_v1 = vmul.f32 %v1800_v33, %v2426_v19 }
 0x17b   : > { %v1359_v22 = vmul.f32 %v1327_v30, %v2279_v27  ;;  %v1262_v55 = vsel %vm942_vm6, %v1198_v56, %v1230_v39  ;;  %v1325_v27 = vmul.f32 %v1808_v53, %v1101_v14  ;;  %v1214_v38 = vadd.f32 1.0, %v1182_v57 }
 0x17c   : > { %v1375_v34 = vmul.f32 %v1343_v29, %v2282_v28  ;;  %1815 = vrcp.f32 %v1262_v55  ;;  %v2447_v49 = vmul.f32 2.0, %v1802_v58  ;;  %v2451_v28 = vadd.f32 %v1043_v46, %v2426_v19 }
 0x17d   : > { %1391 = vst [vmem:[%s2444_s10 + $0x10] sm:$0xff] %v1359_v22  ;;  %v1171_v15 = vadd.f32 %v1139_v1, %v2426_v19  ;;  %v1059_v33 = vmul.f32 %v1802_v58, %v1802_v58  ;;  %1817 = vpow2.f32 %v2354_v51  ;;  %v1357_v30 = vmul.f32 %v1325_v27, %v2285_v31 }
 0x17e   : > { %1407 = vst [vmem:[%s2444_s10 + $0x90] sm:$0xff] %v1375_v34  ;;  %v1810_v40 = vpop.eup %1809  ;;  %v1006_v13 = vadd.f32 1.0, %v2392_v6  ;;  %v1278_v14 = vsel %vm958_vm7, %v1214_v38, %v1246_v25  ;;  %v1155_v63 = vmul.f32 %v1802_v58, %v2447_v49  ;;  %v1104_v56 = vsel %vm944_vm4, %v1008_v50, %v2394_v52 }
 0x17f   : > { %v1341_v29 = vmul.f32 %v1810_v40, %v1117_v10  ;;  %1819 = vrcp.f32 %v1278_v14  ;;  %v1203_v39 = vadd.f32 1.0, %v1171_v15  ;;  %1389 = vst [vmem:[%s2444_s10] sm:$0xff] %v1357_v30  ;;  %v1235_v51 = vadd.f32 2.0, %v2451_v28 }
 0x180   : > { %v1812_v22 = vpop.eup %1811  ;;  %v2466_v31 = vadd.f32 %v1059_v33, %v2447_v49  ;;  %v1187_v6 = vadd.f32 %v1155_v63, %v2447_v49  ;;  %v917_v57 = vmul.f32 1.442695, %v2360_v59  ;;  %v1120_v52 = vsel %vm960_vm5, %v1024_v0, %v2399_v37 }
 0x181   : > { %v1373_v58 = vmul.f32 %v1341_v29, %v2288_v32  ;;  %v1328_v10 = vmul.f32 %v1812_v22, %v1104_v56  ;;  %v836_v50 = vand.u32 2147483647, %v2346_v43  ;;  %v1267_v25 = vsel %vm947_vm8, %v1203_v39, %v1235_v51 }
 0x182   : > { %v1219_v53 = vadd.f32 1.0, %v1187_v6  ;;  %v1251_v34 = vadd.f32 2.0, %v2466_v31  ;;  %v891_v55 = vmul.f32 1.442695, %v2402_v54  ;;  %v1102_v59 = vsel %vm942_vm6, %v1006_v13, %v2415_v11 }
 0x183   : > { %v1814_v46 = vpop.eup %1813  ;;  %1405 = vst [vmem:[%s2444_s10 + $0x80] sm:$0xff] %v1373_v58  ;;  %v1360_v32 = vmul.f32 %v1328_v10, %v2295_v41  ;;  %1821 = vrcp.f32 %v1267_v25  ;;  %v868_v37 = vsub.f32 0.0, %v836_v50  ;;  %v818_v27 = vand.u32 2147483647, %v2363_v60 }
 0x184   : > { %v1344_v0 = vmul.f32 %v1814_v46, %v1120_v52  ;;  %v1283_v1 = vsel %vm963_vm9, %v1219_v53, %v1251_v34  ;;  %1823 = vpow2.f32 %v917_v57  ;;  %v1022_v54 = vadd.f32 1.0, %v2419_v9 }
 0x185   : > { %1392 = vst [vmem:[%s2444_s10 + $0x18] sm:$0xff] %v1360_v32  ;;  %1825 = vrcp.f32 %v1283_v1  ;;  %v923_v38 = vmul.f32 1.442695, %v868_v37  ;;  %v2491_v41 = vadd.f32 %v2276_v24, %v2319_v8  ;;  %v850_v33 = vsub.f32 0.0, %v818_v27 }
 0x186   : > { %v1816_v11 = vpop.eup %1815  ;;  %v1376_v15 = vmul.f32 %v1344_v0, %v2298_v42  ;;  %1827 = vpow2.f32 %v891_v55  ;;  %v2496_v40 = vadd.f32 %v2327_v17, %v2276_v24  ;;  %v1011_v14 = vadd.f32 1.0, %v2426_v19 }
 0x187   : > { %v1818_v30 = vpop.eup %1817  ;;  %v1326_v13 = vmul.f32 %v1816_v11, %v1102_v59  ;;  %1829 = vpow2.f32 %v923_v38  ;;  %v834_v9 = vand.u32 2147483647, %v2491_v41  ;;  %v887_v29 = vmul.f32 1.442695, %v850_v33 }
 0x188   : > { %1408 = vst [vmem:[%s2444_s10 + $0x98] sm:$0xff] %v1376_v15  ;;  %v977_v8 = vmul.f32 2.0, %v1818_v30  ;;  %v1041_v63 = vmul.f32 %v1818_v30, %v1818_v30  ;;  %v823_v42 = vand.u32 2147483647, %v2496_v40  ;;  %v1118_v17 = vsel %vm958_vm7, %v1022_v54, %v2431_v23 }
 0x189   : > { %v1820_v56 = vpop.eup %1819  ;;  %v1358_v39 = vmul.f32 %v1326_v13, %v2301_v47  ;;  %v866_v22 = vsub.f32 0.0, %v834_v9  ;;  %v2508_v19 = vadd.f32 %v2329_v18, %v2276_v24  ;;  %v1027_v6 = vadd.f32 1.0, %v2447_v49 }
 0x18a   : > { %v1342_v51 = vmul.f32 %v1820_v56, %v1118_v17  ;;  %v1073_v57 = vadd.f32 %v1041_v63, %v977_v8  ;;  %v1137_v58 = vmul.f32 %v1818_v30, %v977_v8  ;;  %1831 = vpow2.f32 %v887_v29 }
 0x18b   : > { %1390 = vst [vmem:[%s2444_s10 + $0x8] sm:$0xff] %v1358_v39  ;;  %v919_v10 = vmul.f32 1.442695, %v866_v22  ;;  %v855_v52 = vsub.f32 0.0, %v823_v42  ;;  %v839_v47 = vand.u32 2147483647, %v2508_v19  ;;  %v1107_v18 = vsel %vm947_vm8, %v1011_v14, %v2451_v28 }
 0x18c   : > { %v1374_v50 = vmul.f32 %v1342_v51, %v2304_v48  ;;  %v1169_v23 = vadd.f32 %v1137_v58, %v977_v8  ;;  %v1233_v32 = vadd.f32 2.0, %v1073_v57  ;;  %v1123_v59 = vsel %vm963_vm9, %v1027_v6, %v2466_v31 }
 0x18d   : > { %v1822_v25 = vpop.eup %1821  ;;  %1833 = vpow2.f32 %v919_v10  ;;  %v897_v49 = vmul.f32 1.442695, %v855_v52  ;;  %v871_v53 = vsub.f32 0.0, %v839_v47  ;;  %v1009_v54 = vadd.f32 1.0, %v977_v8 }
 0x18e   : > { %v1824_v34 = vpop.eup %1823  ;;  %1406 = vst [vmem:[%s2444_s10 + $0x88] sm:$0xff] %v1374_v50  ;;  %v1331_v55 = vmul.f32 %v1822_v25, %v1107_v18  ;;  %v1201_v46 = vadd.f32 1.0, %v1169_v23  ;;  %v2533_v8 = vadd.f32 %v2276_v24, %v2331_v20  ;;  %vm964_vm13 = vcmp.ge.f32.partialorder %v2346_v43, 0.0 }
 0x18f   : > { %v1826_v48 = vpop.eup %1825  ;;  %v993_v37 = vmul.f32 2.0, %v1824_v34  ;;  %v1057_v0 = vmul.f32 %v1824_v34, %v1824_v34  ;;  %1835 = vpow2.f32 %v897_v49  ;;  %v929_v30 = vmul.f32 1.442695, %v871_v53 }
 0x190   : > { %v1828_v28 = vpop.eup %1827  ;;  %v1363_v1 = vmul.f32 %v1331_v55, %v2311_v3  ;;  %v1347_v27 = vmul.f32 %v1826_v48, %v1123_v59  ;;  %v1265_v38 = vsel %vm945_vm10, %v1201_v46, %v1233_v32  ;;  %v1105_v51 = vsel %vm945_vm10, %v1009_v54, %v1073_v57 }
 0x191   : > { %v1830_v11 = vpop.eup %1829  ;;  %1837 = vrcp.f32 %v1265_v38  ;;  %v2526_v15 = vadd.f32 %v1057_v0, %v993_v37  ;;  %v1153_v33 = vmul.f32 %v1824_v34, %v993_v37  ;;  %v980_v13 = vmul.f32 2.0, %v1828_v28 }
 0x192   : > { %1395 = vst [vmem:[%s2444_s10 + $0x30] sm:$0xff] %v1363_v1  ;;  %v1379_v31 = vmul.f32 %v1347_v27, %v2314_v4  ;;  %v1044_v14 = vmul.f32 %v1828_v28, %v1828_v28  ;;  %v996_v9 = vmul.f32 2.0, %v1830_v11  ;;  %v1060_v3 = vmul.f32 %v1830_v11, %v1830_v11 }
 0x193   : > { %v1185_v63 = vadd.f32 %v1153_v33, %v993_v37  ;;  %v1249_v29 = vadd.f32 2.0, %v2526_v15  ;;  %v1140_v56 = vmul.f32 %v1828_v28, %v980_v13  ;;  %1839 = vpow2.f32 %v929_v30 }
 0x194   : > { %1411 = vst [vmem:[%s2444_s10 + $0xb0] sm:$0xff] %v1379_v31  ;;  %v1076_v42 = vadd.f32 %v1044_v14, %v980_v13  ;;  %v1832_v39 = vpop.eup %1831  ;;  %v1092_v17 = vadd.f32 %v1060_v3, %v996_v9  ;;  %v1156_v22 = vmul.f32 %v1830_v11, %v996_v9  ;;  %vm946_vm14 = vcmp.ge.f32.partialorder %v2363_v60, 0.0 }
 0x195   : > { %v1217_v4 = vadd.f32 1.0, %v1185_v63  ;;  %v1172_v6 = vadd.f32 %v1140_v56, %v980_v13  ;;  %v978_v20 = vmul.f32 2.0, %v1832_v39  ;;  %v2543_v58 = vadd.f32 %v2276_v24, %v2333_v21 }
 0x196   : > { %v1236_v47 = vadd.f32 2.0, %v1076_v42  ;;  %v1188_v50 = vadd.f32 %v1156_v22, %v996_v9  ;;  %v821_v23 = vand.u32 2147483647, %v2533_v8  ;;  %v1252_v18 = vadd.f32 2.0, %v1092_v17 }
 0x197   : > { %v1834_v10 = vpop.eup %1833  ;;  %v1281_v52 = vsel %vm961_vm11, %v1217_v4, %v1249_v29  ;;  %v1204_v25 = vadd.f32 1.0, %v1172_v6  ;;  %v1042_v57 = vmul.f32 %v1832_v39, %v1832_v39  ;;  %v1138_v34 = vmul.f32 %v1832_v39, %v978_v20 }
 0x198   : > { %1841 = vrcp.f32 %v1281_v52  ;;  %v1220_v53 = vadd.f32 1.0, %v1188_v50  ;;  %v994_v55 = vmul.f32 2.0, %v1834_v10  ;;  %v1058_v46 = vmul.f32 %v1834_v10, %v1834_v10 }
 0x199   : > { %v1836_v49 = vpop.eup %1835  ;;  %v1268_v21 = vsel %vm948_vm12, %v1204_v25, %v1236_v47  ;;  %v2550_v32 = vadd.f32 %v1042_v57, %v978_v20  ;;  %vm962_vm15 = vcmp.ge.f32.partialorder %v2491_v41, 0.0  ;;  %v1025_v28 = vadd.f32 1.0, %v993_v37 }
 0x19a   : > { %v2553_v48 = vmul.f32 2.0, %v1836_v49  ;;  %v1047_v59 = vmul.f32 %v1836_v49, %v1836_v49  ;;  %1843 = vrcp.f32 %v1268_v21  ;;  %v1284_v1 = vsel %vm964_vm13, %v1220_v53, %v1252_v18 }
 0x19b   : > { %v1838_v0 = vpop.eup %1837  ;;  %v1170_v27 = vadd.f32 %v1138_v34, %v978_v20  ;;  %v1012_v38 = vadd.f32 1.0, %v980_v13  ;;  %v1028_v11 = vadd.f32 1.0, %v996_v9  ;;  %1845 = vrcp.f32 %v1284_v1 }
 0x19c   : > { %v1329_v54 = vmul.f32 %v1838_v0, %v1105_v51  ;;  %v1234_v30 = vadd.f32 2.0, %v2550_v32  ;;  %v2558_v31 = vadd.f32 %v1058_v46, %v994_v55  ;;  %v1154_v14 = vmul.f32 %v1834_v10, %v994_v55 }
 0x19d   : > { %v1202_v33 = vadd.f32 1.0, %v1170_v27  ;;  %v2562_v37 = vadd.f32 %v1047_v59, %v2553_v48  ;;  %v1143_v3 = vmul.f32 %v1836_v49, %v2553_v48  ;;  %v853_v29 = vsub.f32 0.0, %v821_v23  ;;  %v1840_v56 = vpop.eup %1839 }
 0x19e   : > { %v1361_v63 = vmul.f32 %v1329_v54, %v2317_v7  ;;  %v1121_v13 = vsel %vm961_vm11, %v1025_v28, %v2526_v15  ;;  %v1186_v39 = vadd.f32 %v1154_v14, %v994_v55  ;;  %vm951_vm0 = vcmp.ge.f32.partialorder %v2496_v40, 0.0 }
 0x19f   : > { %v1266_v9 = vsel %vm946_vm14, %v1202_v33, %v1234_v30  ;;  %v1108_v7 = vsel %vm948_vm12, %v1012_v38, %v1076_v42  ;;  %v1124_v4 = vsel %vm964_vm13, %v1028_v11, %v1092_v17  ;;  %v1175_v22 = vadd.f32 %v1143_v3, %v2553_v48 }
 0x1a0   : > { %1393 = vst [vmem:[%s2444_s10 + $0x20] sm:$0xff] %v1361_v63  ;;  %1847 = vrcp.f32 %v1266_v9  ;;  %v1218_v51 = vadd.f32 1.0, %v1186_v39  ;;  %v1250_v6 = vadd.f32 2.0, %v2558_v31  ;;  %v2578_v15 = vmul.f32 2.0, %v1840_v56 }
 0x1a1   : > { %v1063_v10 = vmul.f32 %v1840_v56, %v1840_v56  ;;  %v1207_v47 = vadd.f32 1.0, %v1175_v22  ;;  %v1239_v50 = vadd.f32 2.0, %v2562_v37  ;;  %v893_v23 = vmul.f32 1.442695, %v853_v29 }
 0x1a2   : > { %v1842_v52 = vpop.eup %1841  ;;  %v837_v25 = vand.u32 2147483647, %v2543_v58  ;;  %v1010_v18 = vadd.f32 1.0, %v978_v20  ;;  %v1282_v17 = vsel %vm962_vm15, %v1218_v51, %v1250_v6  ;;  %v1159_v53 = vmul.f32 %v1840_v56, %v2578_v15 }
 0x1a3   : > { %v1345_v42 = vmul.f32 %v1842_v52, %v1121_v13  ;;  %v2585_v57 = vadd.f32 %v1063_v10, %v2578_v15  ;;  %1849 = vrcp.f32 %v1282_v17  ;;  %v1271_v49 = vsel %vm951_vm0, %v1207_v47, %v1239_v50 }
 0x1a4   : > { %v869_v34 = vsub.f32 0.0, %v837_v25  ;;  %v1844_v46 = vpop.eup %1843  ;;  %v1026_v59 = vadd.f32 1.0, %v994_v55  ;;  %1851 = vrcp.f32 %v1271_v49  ;;  %v1191_v1 = vadd.f32 %v1159_v53, %v2578_v15 }
 0x1a5   : > { %v1377_v21 = vmul.f32 %v1345_v42, %v2325_v16  ;;  %v1255_v20 = vadd.f32 2.0, %v2585_v57  ;;  %v1846_v0 = vpop.eup %1845  ;;  %v1332_v28 = vmul.f32 %v1844_v46, %v1108_v7  ;;  %1853 = vpow2.f32 %v893_v23 }
 0x1a6   : > { %v925_v27 = vmul.f32 1.442695, %v869_v34  ;;  %v1348_v54 = vmul.f32 %v1846_v0, %v1124_v4  ;;  %v2596_v38 = vadd.f32 %v2341_v35, %v2276_v24  ;;  %v2600_v16 = vadd.f32 %v2343_v36, %v2276_v24 }
 0x1a7   : > { %1409 = vst [vmem:[%s2444_s10 + $0xa0] sm:$0xff] %v1377_v21  ;;  %v2604_v55 = vadd.f32 %v2276_v24, %v2348_v44  ;;  %v1364_v11 = vmul.f32 %v1332_v28, %v2337_v26  ;;  %v1223_v33 = vadd.f32 1.0, %v1191_v1  ;;  %v2609_v30 = vadd.f32 %v2276_v24, %v2350_v45 }
 0x1a8   : > { %1855 = vpow2.f32 %v925_v27  ;;  %v1380_v35 = vmul.f32 %v1348_v54, %v2346_v43  ;;  %vm967_vm1 = vcmp.ge.f32.partialorder %v2508_v19, 0.0  ;;  %v824_v36 = vand.u32 2147483647, %v2596_v38 }
 0x1a9   : > { %v840_v14 = vand.u32 2147483647, %v2600_v16  ;;  %1396 = vst [vmem:[%s2444_s10 + $0x38] sm:$0xff] %v1364_v11  ;;  %v1106_v26 = vsel %vm946_vm14, %v1010_v18, %v2550_v32  ;;  %v1015_v44 = vadd.f32 1.0, %v2553_v48  ;;  %v1287_v45 = vsel %vm967_vm1, %v1223_v33, %v1255_v20 }
 0x1aa   : > { %v1848_v63 = vpop.eup %1847  ;;  %v822_v3 = vand.u32 2147483647, %v2604_v55  ;;  %1412 = vst [vmem:[%s2444_s10 + $0xb8] sm:$0xff] %v1380_v35  ;;  %1857 = vrcp.f32 %v1287_v45  ;;  %v856_v29 = vsub.f32 0.0, %v824_v36  ;;  %v1122_v13 = vsel %vm962_vm15, %v1026_v59, %v2558_v31 }
 0x1ab   : > { %v1330_v43 = vmul.f32 %v1848_v63, %v1106_v26  ;;  %v872_v56 = vsub.f32 0.0, %v840_v14  ;;  %v838_v32 = vand.u32 2147483647, %v2609_v30  ;;  %v2630_v48 = vadd.f32 %v2365_v61, %v2276_v24 }
 0x1ac   : > { %v854_v9 = vsub.f32 0.0, %v822_v3  ;;  %v899_v7 = vmul.f32 1.442695, %v856_v29  ;;  %v2635_v22 = vadd.f32 %v2367_v62, %v2276_v24  ;;  %v1111_v31 = vsel %vm951_vm0, %v1015_v44, %v2562_v37 }
 0x1ad   : > { %v1362_v39 = vmul.f32 %v1330_v43, %v2363_v60  ;;  %v931_v4 = vmul.f32 1.442695, %v872_v56  ;;  %v1850_v51 = vpop.eup %1849  ;;  %v870_v10 = vsub.f32 0.0, %v838_v32  ;;  %v827_v52 = vand.u32 2147483647, %v2630_v48 }
 0x1ae   : > { %v895_v6 = vmul.f32 1.442695, %v854_v9  ;;  %v1852_v47 = vpop.eup %1851  ;;  %v1346_v61 = vmul.f32 %v1850_v51, %v1122_v13  ;;  %v1031_v60 = vadd.f32 1.0, %v2578_v15  ;;  %1859 = vpow2.f32 %v899_v7 }
 0x1af   : > { %1394 = vst [vmem:[%s2444_s10 + $0x28] sm:$0xff] %v1362_v39  ;;  %v843_v50 = vand.u32 2147483647, %v2635_v22  ;;  %v1854_v62 = vpop.eup %1853  ;;  %v1335_v23 = vmul.f32 %v1852_v47, %v1111_v31  ;;  %1861 = vpow2.f32 %v931_v4  ;;  %v927_v25 = vmul.f32 1.442695, %v870_v10 }
 0x1b0   : > { %v859_v42 = vsub.f32 0.0, %v827_v52  ;;  %v1378_v37 = vmul.f32 %v1346_v61, %v2491_v41  ;;  %v981_v18 = vmul.f32 2.0, %v1854_v62  ;;  %v1045_v17 = vmul.f32 %v1854_v62, %v1854_v62 }
 0x1b1   : > { %1863 = vpow2.f32 %v895_v6  ;;  %v1367_v53 = vmul.f32 %v1335_v23, %v2496_v40  ;;  %v875_v59 = vsub.f32 0.0, %v843_v50  ;;  %v1127_v41 = vsel %vm967_vm1, %v1031_v60, %v2585_v57 }
 0x1b2   : > { %v1856_v49 = vpop.eup %1855  ;;  %1865 = vpow2.f32 %v927_v25  ;;  %v905_v15 = vmul.f32 1.442695, %v859_v42  ;;  %1410 = vst [vmem:[%s2444_s10 + $0xa8] sm:$0xff] %v1378_v37  ;;  %v1077_v34 = vadd.f32 %v1045_v17, %v981_v18  ;;  %v1141_v46 = vmul.f32 %v1854_v62, %v981_v18 }
 0x1b3   : > { %v997_v21 = vmul.f32 2.0, %v1856_v49  ;;  %1399 = vst [vmem:[%s2444_s10 + $0x50] sm:$0xff] %v1367_v53  ;;  %v1061_v20 = vmul.f32 %v1856_v49, %v1856_v49  ;;  %v2653_v1 = vadd.f32 %v2276_v24, %v2370_v2  ;;  %vm949_vm2 = vcmp.ge.f32.partialorder %v2533_v8, 0.0 }
 0x1b4   : > { %1867 = vpow2.f32 %v905_v15  ;;  %v1858_v0 = vpop.eup %1857  ;;  %v1173_v28 = vadd.f32 %v1141_v46, %v981_v18  ;;  %v1237_v33 = vadd.f32 2.0, %v1077_v34  ;;  %v937_v35 = vmul.f32 1.442695, %v875_v59 }
 0x1b5   : > { %v1351_v40 = vmul.f32 %v1858_v0, %v1127_v41  ;;  %v1093_v27 = vadd.f32 %v1061_v20, %v997_v21  ;;  %v1157_v54 = vmul.f32 %v1856_v49, %v997_v21  ;;  %v1013_v14 = vadd.f32 1.0, %v981_v18 }
 0x1b6   : > { %v1205_v11 = vadd.f32 1.0, %v1173_v28  ;;  %vm965_vm3 = vcmp.ge.f32.partialorder %v2543_v58, 0.0  ;;  %v1029_v26 = vadd.f32 1.0, %v997_v21  ;;  %vm952_vm4 = vcmp.ge.f32.partialorder %v2596_v38, 0.0 }
 0x1b7   : > { %v1383_v36 = vmul.f32 %v1351_v40, %v2508_v19  ;;  %v1189_v57 = vadd.f32 %v1157_v54, %v997_v21  ;;  %v1253_v44 = vadd.f32 2.0, %v1093_v27  ;;  %v825_v45 = vand.u32 2147483647, %v2653_v1 }
 0x1b8   : > { %v1860_v63 = vpop.eup %1859  ;;  %v1269_v2 = vsel %vm949_vm2, %v1205_v11, %v1237_v33  ;;  %v2665_v32 = vadd.f32 %v2276_v24, %v2372_v5  ;;  %vm968_vm5 = vcmp.ge.f32.partialorder %v2600_v16, 0.0  ;;  %v1109_v31 = vsel %vm949_vm2, %v1013_v14, %v1077_v34 }
 0x1b9   : > { %v1862_v3 = vpop.eup %1861  ;;  %1415 = vst [vmem:[%s2444_s10 + $0xd0] sm:$0xff] %v1383_v36  ;;  %1869 = vrcp.f32 %v1269_v2  ;;  %v1221_v43 = vadd.f32 1.0, %v1189_v57  ;;  %v984_v29 = vmul.f32 2.0, %v1860_v63  ;;  %v1048_v19 = vmul.f32 %v1860_v63, %v1860_v63 }
 0x1ba   : > { %v1000_v13 = vmul.f32 2.0, %v1862_v3  ;;  %v1064_v9 = vmul.f32 %v1862_v3, %v1862_v3  ;;  %1871 = vpow2.f32 %v937_v35  ;;  %vm950_vm6 = vcmp.ge.f32.partialorder %v2604_v55, 0.0 }
 0x1bb   : > { %v1864_v56 = vpop.eup %1863  ;;  %v1285_v7 = vsel %vm965_vm3, %v1221_v43, %v1253_v44  ;;  %v1080_v4 = vadd.f32 %v1048_v19, %v984_v29  ;;  %v1144_v51 = vmul.f32 %v1860_v63, %v984_v29  ;;  %v1125_v24 = vsel %vm965_vm3, %v1029_v26, %v1093_v27 }
 0x1bc   : > { %v1866_v39 = vpop.eup %1865  ;;  %1873 = vrcp.f32 %v1285_v7  ;;  %v2672_v6 = vadd.f32 %v1064_v9, %v1000_v13  ;;  %v1160_v10 = vmul.f32 %v1862_v3, %v1000_v13  ;;  %v982_v47 = vmul.f32 2.0, %v1864_v56 }
 0x1bd   : > { %v1176_v5 = vadd.f32 %v1144_v51, %v984_v29  ;;  %v857_v61 = vsub.f32 0.0, %v825_v45  ;;  %v1240_v60 = vadd.f32 2.0, %v1080_v4  ;;  %v1046_v62 = vmul.f32 %v1864_v56, %v1864_v56 }
 0x1be   : > { %v1868_v52 = vpop.eup %1867  ;;  %v1192_v50 = vadd.f32 %v1160_v10, %v1000_v13  ;;  %vm966_vm7 = vcmp.ge.f32.partialorder %v2609_v30, 0.0  ;;  %v841_v23 = vand.u32 2147483647, %v2665_v32  ;;  %v1256_v42 = vadd.f32 2.0, %v2672_v6 }
 0x1bf   : > { %v1208_v25 = vadd.f32 1.0, %v1176_v5  ;;  %v1142_v37 = vmul.f32 %v1864_v56, %v982_v47  ;;  %v998_v18 = vmul.f32 2.0, %v1866_v39  ;;  %v2680_v49 = vadd.f32 %v1046_v62, %v982_v47 }
 0x1c0   : > { %v1224_v17 = vadd.f32 1.0, %v1192_v50  ;;  %v1062_v53 = vmul.f32 %v1866_v39, %v1866_v39  ;;  %v2682_v15 = vmul.f32 2.0, %v1868_v52  ;;  %vm955_vm8 = vcmp.ge.f32.partialorder %v2630_v48, 0.0 }
 0x1c1   : > { %v1272_v34 = vsel %vm952_vm4, %v1208_v25, %v1240_v60  ;;  %v1174_v46 = vadd.f32 %v1142_v37, %v982_v47  ;;  %v1158_v21 = vmul.f32 %v1866_v39, %v998_v18  ;;  %v901_v59 = vmul.f32 1.442695, %v857_v61 }
 0x1c2   : > { %1875 = vrcp.f32 %v1272_v34  ;;  %v1288_v20 = vsel %vm968_vm5, %v1224_v17, %v1256_v42  ;;  %v1238_v0 = vadd.f32 2.0, %v2680_v49  ;;  %v873_v41 = vsub.f32 0.0, %v841_v23  ;;  %v2900_v23 = vld [vmem:[#allocation12_spill] sm:$0xff]  ;;  %v2901_v17 = vld [vmem:[#allocation13_spill] sm:$0xff] }
 0x1c3   : > { %v1870_v28 = vpop.eup %1869  ;;  %1877 = vrcp.f32 %v1288_v20  ;;  %v1206_v40 = vadd.f32 1.0, %v1174_v46  ;;  %v2690_v27 = vadd.f32 %v1062_v53, %v998_v18  ;;  %v1190_v54 = vadd.f32 %v1158_v21, %v998_v18 }
 0x1c4   : > { %v1872_v11 = vpop.eup %1871  ;;  %v1333_v33 = vmul.f32 %v1870_v28, %v1109_v31  ;;  %v1016_v35 = vadd.f32 1.0, %v984_v29  ;;  %v1051_v36 = vmul.f32 %v1868_v52, %v1868_v52  ;;  %v1147_v14 = vmul.f32 %v1868_v52, %v2682_v15 }
 0x1c5   : > { %v1032_v57 = vadd.f32 1.0, %v1000_v13  ;;  %v1270_v63 = vsel %vm950_vm6, %v1206_v40, %v1238_v0  ;;  %v1222_v2 = vadd.f32 1.0, %v1190_v54  ;;  %v1254_v26 = vadd.f32 2.0, %v2690_v27 }
 0x1c6   : > { %v1874_v44 = vpop.eup %1873  ;;  %v1365_v45 = vmul.f32 %v1333_v33, %v2533_v8  ;;  %1879 = vrcp.f32 %v1270_v63  ;;  %v2698_v3 = vadd.f32 %v1051_v36, %v2682_v15  ;;  %v1179_v43 = vadd.f32 %v1147_v14, %v2682_v15 }
 0x1c7   : > { %vm971_vm9 = vcmp.ge.f32.partialorder %v2635_v22, 0.0  ;;  %v1349_v29 = vmul.f32 %v1874_v44, %v1125_v24  ;;  %v1286_v19 = vsel %vm966_vm7, %v1222_v2, %v1254_v26  ;;  %v2704_v56 = vmul.f32 2.0, %v1872_v11 }
 0x1c8   : > { %v1067_v13 = vmul.f32 %v1872_v11, %v1872_v11  ;;  %1397 = vst [vmem:[%s2444_s10 + $0x40] sm:$0xff] %v1365_v45  ;;  %v1112_v8 = vsel %vm952_vm4, %v1016_v35, %v1080_v4  ;;  %1881 = vrcp.f32 %v1286_v19  ;;  %v1211_v9 = vadd.f32 1.0, %v1179_v43  ;;  %v1911_v4 = vld [vmem:[%s2878_s2] ss:$0 sm:$0xff] }
 0x1c9   : > { %v1243_v39 = vadd.f32 2.0, %v2698_v3  ;;  %v1381_v7 = vmul.f32 %v1349_v29, %v2543_v58  ;;  %v1014_v51 = vadd.f32 1.0, %v982_v47  ;;  %v1163_v10 = vmul.f32 %v1872_v11, %v2704_v56 }
 0x1ca   : > { %v2712_v31 = vadd.f32 %v1067_v13, %v2704_v56  ;;  %1883 = vpow2.f32 %v901_v59  ;;  %v933_v24 = vmul.f32 1.442695, %v873_v41  ;;  %v2721_v5 = vadd.f32 %v1911_v4, %v2375_v12 }
 0x1cb   : > { %v1275_v52 = vsel %vm955_vm8, %v1211_v9, %v1243_v39  ;;  %1413 = vst [vmem:[%s2444_s10 + $0xc0] sm:$0xff] %v1381_v7  ;;  %v1128_v58 = vsel %vm968_vm5, %v1032_v57, %v2672_v6  ;;  %v1030_v47 = vadd.f32 1.0, %v998_v18  ;;  %v1195_v61 = vadd.f32 %v1163_v10, %v2704_v56  ;;  %v2902_v6 = vld [vmem:[#allocation14_spill] sm:$0xff] }
 0x1cc   : > { %1885 = vrcp.f32 %v1275_v52  ;;  %v1876_v60 = vpop.eup %1875  ;;  %v1259_v50 = vadd.f32 2.0, %v2712_v31  ;;  %v828_v62 = vand.u32 2147483647, %v2721_v5  ;;  %v2731_v25 = vadd.f32 %v1911_v4, %v2900_v23 }
 0x1cd   : > { %1887 = vpow2.f32 %v933_v24  ;;  %v1878_v12 = vpop.eup %1877  ;;  %v1336_v42 = vmul.f32 %v1876_v60, %v1112_v8  ;;  %v1227_v37 = vadd.f32 1.0, %v1195_v61  ;;  %v2734_v53 = vadd.f32 %v1911_v4, %v2901_v17 }
 0x1ce   : > { %v2737_v18 = vadd.f32 %v1911_v4, %v2902_v6  ;;  %v1352_v34 = vmul.f32 %v1878_v12, %v1128_v58  ;;  %v1110_v46 = vsel %vm950_vm6, %v1014_v51, %v2680_v49  ;;  %v860_v21 = vsub.f32 0.0, %v828_v62 }
 0x1cf   : > { %v844_v59 = vand.u32 2147483647, %v2731_v25  ;;  %v1368_v20 = vmul.f32 %v1336_v42, %v2596_v38  ;;  %v1019_v0 = vadd.f32 1.0, %v2682_v15  ;;  %v1291_v41 = vsel %vm971_vm9, %v1227_v37, %v1259_v50 }
 0x1d0   : > { %v826_v28 = vand.u32 2147483647, %v2734_v53  ;;  %v1880_v40 = vpop.eup %1879  ;;  %v1384_v54 = vmul.f32 %v1352_v34, %v2600_v16  ;;  %1889 = vrcp.f32 %v1291_v41  ;;  %v907_v11 = vmul.f32 1.442695, %v860_v21 }
 0x1d1   : > { %v876_v33 = vsub.f32 0.0, %v844_v59  ;;  %1400 = vst [vmem:[%s2444_s10 + $0x58] sm:$0xff] %v1368_v20  ;;  %v1334_v49 = vmul.f32 %v1880_v40, %v1110_v46  ;;  %v842_v36 = vand.u32 2147483647, %v2737_v18  ;;  %v1126_v15 = vsel %vm966_vm7, %v1030_v47, %v2690_v27 }
 0x1d2   : > { %v858_v35 = vsub.f32 0.0, %v826_v28  ;;  %v1882_v38 = vpop.eup %1881  ;;  %1416 = vst [vmem:[%s2444_s10 + $0xd8] sm:$0xff] %v1384_v54  ;;  %1891 = vpow2.f32 %v907_v11  ;;  %v1115_v44 = vsel %vm955_vm8, %v1019_v0, %v2698_v3  ;;  %v1035_v13 = vadd.f32 1.0, %v2704_v56 }
 0x1d3   : > { %v939_v14 = vmul.f32 1.442695, %v876_v33  ;;  %v1366_v57 = vmul.f32 %v1334_v49, %v2604_v55  ;;  %v1350_v16 = vmul.f32 %v1882_v38, %v1126_v15  ;;  %v874_v2 = vsub.f32 0.0, %v842_v36 }
 0x1d4   : > { %v903_v63 = vmul.f32 1.442695, %v858_v35  ;;  %v1884_v26 = vpop.eup %1883  ;;  %v1131_v52 = vsel %vm971_vm9, %v1035_v13, %v2712_v31  ;;  %vm953_vm10 = vcmp.ge.f32.partialorder %v2653_v1, 0.0  ;;  %vm969_vm11 = vcmp.ge.f32.partialorder %v2665_v32, 0.0 }
 0x1d5   : > { %1893 = vpow2.f32 %v939_v14  ;;  %1398 = vst [vmem:[%s2444_s10 + $0x48] sm:$0xff] %v1366_v57  ;;  %v1382_v43 = vmul.f32 %v1350_v16, %v2609_v30  ;;  %v985_v29 = vmul.f32 2.0, %v1884_v26  ;;  %v1049_v27 = vmul.f32 %v1884_v26, %v1884_v26 }
 0x1d6   : > { %v1886_v45 = vpop.eup %1885  ;;  %1895 = vpow2.f32 %v903_v63  ;;  %v935_v8 = vmul.f32 1.442695, %v874_v2  ;;  %vm956_vm12 = vcmp.ge.f32.partialorder %v2721_v5, 0.0  ;;  %vm972_vm13 = vcmp.ge.f32.partialorder %v2731_v25, 0.0 }
 0x1d7   : > { %v1888_v19 = vpop.eup %1887  ;;  %v1339_v55 = vmul.f32 %v1886_v45, %v1115_v44  ;;  %1414 = vst [vmem:[%s2444_s10 + $0xc8] sm:$0xff] %v1382_v43  ;;  %v2763_v9 = vadd.f32 %v1049_v27, %v985_v29  ;;  %v1145_v39 = vmul.f32 %v1884_v26, %v985_v29  ;;  %v1017_v35 = vadd.f32 1.0, %v985_v29 }
 0x1d8   : > { %v1001_v7 = vmul.f32 2.0, %v1888_v19  ;;  %v1065_v51 = vmul.f32 %v1888_v19, %v1888_v19  ;;  %1897 = vpow2.f32 %v935_v8  ;;  %vm954_vm14 = vcmp.ge.f32.partialorder %v2734_v53, 0.0 }
 0x1d9   : > { %v1371_v3 = vmul.f32 %v1339_v55, %v2630_v48  ;;  %v1177_v10 = vadd.f32 %v1145_v39, %v985_v29  ;;  %v1241_v47 = vadd.f32 2.0, %v2763_v9  ;;  %v1113_v29 = vsel %vm953_vm10, %v1017_v35, %v2763_v9 }
 0x1da   : > { %v1890_v30 = vpop.eup %1889  ;;  %v2770_v24 = vadd.f32 %v1065_v51, %v1001_v7  ;;  %v1161_v56 = vmul.f32 %v1888_v19, %v1001_v7  ;;  %v1033_v57 = vadd.f32 1.0, %v1001_v7  ;;  %vm970_vm15 = vcmp.ge.f32.partialorder %v2737_v18, 0.0 }
 0x1db   : > { %1403 = vst [vmem:[%s2444_s10 + $0x70] sm:$0xff] %v1371_v3  ;;  %v1355_v4 = vmul.f32 %v1890_v30, %v1131_v52  ;;  %v1209_v58 = vadd.f32 1.0, %v1177_v10 }
 0x1dc   : > { %v1892_v61 = vpop.eup %1891  ;;  %v1193_v48 = vadd.f32 %v1161_v56, %v1001_v7  ;;  %v1257_v42 = vadd.f32 2.0, %v2770_v24  ;;  %v1129_v9 = vsel %vm969_vm11, %v1033_v57, %v2770_v24 }
 0x1dd   : > { %v1387_v60 = vmul.f32 %v1355_v4, %v2635_v22  ;;  %v1273_v50 = vsel %vm953_vm10, %v1209_v58, %v1241_v47  ;;  %v988_v62 = vmul.f32 2.0, %v1892_v61  ;;  %v1052_v23 = vmul.f32 %v1892_v61, %v1892_v61 }
 0x1de   : > { %1899 = vrcp.f32 %v1273_v50  ;;  %v1225_v12 = vadd.f32 1.0, %v1193_v48 }
 0x1df   : > { %v1894_v31 = vpop.eup %1893  ;;  %1419 = vst [vmem:[%s2444_s10 + $0xf0] sm:$0xff] %v1387_v60  ;;  %v1084_v17 = vadd.f32 %v1052_v23, %v988_v62  ;;  %v1148_v6 = vmul.f32 %v1892_v61, %v988_v62  ;;  %v1020_v10 = vadd.f32 1.0, %v988_v62 }
 0x1e0   : > { %v1896_v37 = vpop.eup %1895  ;;  %v1004_v34 = vmul.f32 2.0, %v1894_v31  ;;  %v1289_v22 = vsel %vm969_vm11, %v1225_v12, %v1257_v42  ;;  %v1068_v46 = vmul.f32 %v1894_v31, %v1894_v31 }
 0x1e1   : > { %v986_v21 = vmul.f32 2.0, %v1896_v37  ;;  %v1050_v59 = vmul.f32 %v1896_v37, %v1896_v37  ;;  %1901 = vrcp.f32 %v1289_v22  ;;  %v1180_v20 = vadd.f32 %v1148_v6, %v988_v62 }
 0x1e2   : > { %v1898_v0 = vpop.eup %1897  ;;  %v1244_v41 = vadd.f32 2.0, %v1084_v17  ;;  %v1100_v28 = vadd.f32 %v1068_v46, %v1004_v34  ;;  %v1164_v40 = vmul.f32 %v1894_v31, %v1004_v34  ;;  %v1036_v56 = vadd.f32 1.0, %v1004_v34 }
 0x1e3   : > { %v1212_v54 = vadd.f32 1.0, %v1180_v20  ;;  %v1082_v11 = vadd.f32 %v1050_v59, %v986_v21  ;;  %v1146_v33 = vmul.f32 %v1896_v37, %v986_v21  ;;  %v1002_v49 = vmul.f32 2.0, %v1898_v0 }
 0x1e4   : > { %v1196_v36 = vadd.f32 %v1164_v40, %v1004_v34  ;;  %v1066_v38 = vmul.f32 %v1898_v0, %v1898_v0  ;;  %v1260_v63 = vadd.f32 2.0, %v1100_v28  ;;  %v1116_v24 = vsel %vm956_vm12, %v1020_v10, %v1084_v17 }
 0x1e5   : > { %v1276_v15 = vsel %vm956_vm12, %v1212_v54, %v1244_v41  ;;  %v1178_v14 = vadd.f32 %v1146_v33, %v986_v21  ;;  %v1242_v26 = vadd.f32 2.0, %v1082_v11  ;;  %v1162_v45 = vmul.f32 %v1898_v0, %v1002_v49 }
 0x1e6   : > { %1903 = vrcp.f32 %v1276_v15  ;;  %v1228_v16 = vadd.f32 1.0, %v1196_v36  ;;  %v1098_v44 = vadd.f32 %v1066_v38, %v1002_v49  ;;  %v1018_v4 = vadd.f32 1.0, %v986_v21 }
 0x1e7   : > { %v1210_v2 = vadd.f32 1.0, %v1178_v14  ;;  %v1194_v13 = vadd.f32 %v1162_v45, %v1002_v49  ;;  %v1132_v48 = vsel %vm972_vm13, %v1036_v56, %v1100_v28  ;;  %v1034_v62 = vadd.f32 1.0, %v1002_v49 }
 0x1e8   : > { %v1900_v43 = vpop.eup %1899  ;;  %v1292_v27 = vsel %vm972_vm13, %v1228_v16, %v1260_v63  ;;  %v1258_v3 = vadd.f32 2.0, %v1098_v44  ;;  %v1114_v50 = vsel %vm954_vm14, %v1018_v4, %v1082_v11 }
 0x1e9   : > { %v1337_v19 = vmul.f32 %v1900_v43, %v1113_v29  ;;  %1905 = vrcp.f32 %v1292_v27  ;;  %v1274_v55 = vsel %vm954_vm14, %v1210_v2, %v1242_v26  ;;  %v1226_v7 = vadd.f32 1.0, %v1194_v13 }
 0x1ea   : > { %1907 = vrcp.f32 %v1274_v55  ;;  %v1130_v42 = vsel %vm970_vm15, %v1034_v62, %v1098_v44 }
 0x1eb   : > { %v1902_v8 = vpop.eup %1901  ;;  %v1369_v39 = vmul.f32 %v1337_v19, %v2653_v1  ;;  %v1290_v30 = vsel %vm970_vm15, %v1226_v7, %v1258_v3 }
 0x1ec   : > { %v1353_v51 = vmul.f32 %v1902_v8, %v1129_v9  ;;  %1909 = vrcp.f32 %v1290_v30 }
 0x1ed   : > { %1401 = vst [vmem:[%s2444_s10 + $0x60] sm:$0xff] %v1369_v39 }
 0x1ee   : > { %v1385_v52 = vmul.f32 %v1353_v51, %v2665_v32 }
 0x1f0   : > { %v1904_v1 = vpop.eup %1903  ;;  %1417 = vst [vmem:[%s2444_s10 + $0xe0] sm:$0xff] %v1385_v52 }
 0x1f1   : > { %v1340_v58 = vmul.f32 %v1904_v1, %v1116_v24 }
 0x1f3   : > { %v1906_v47 = vpop.eup %1905  ;;  %v1372_v61 = vmul.f32 %v1340_v58, %v2721_v5 }
 0x1f4   : > { %v1908_v32 = vpop.eup %1907  ;;  %v1356_v60 = vmul.f32 %v1906_v47, %v1132_v48 }
 0x1f5   : > { %1404 = vst [vmem:[%s2444_s10 + $0x78] sm:$0xff] %v1372_v61  ;;  %v1338_v23 = vmul.f32 %v1908_v32, %v1114_v50 }
 0x1f6   : > { %v1388_v31 = vmul.f32 %v1356_v60, %v2731_v25  ;;  %v1910_v5 = vpop.eup %1909 }
 0x1f7   : > { %v1370_v12 = vmul.f32 %v1338_v23, %v2734_v53  ;;  %v1354_v37 = vmul.f32 %v1910_v5, %v1130_v42 }
 0x1f8   : > { %1420 = vst [vmem:[%s2444_s10 + $0xf8] sm:$0xff] %v1388_v31 }
 0x1f9   : > { %1402 = vst [vmem:[%s2444_s10 + $0x68] sm:$0xff] %v1370_v12  ;;  %v1386_v25 = vmul.f32 %v1354_v37, %v2737_v18 }
 0x1fb   : > { %1418 = vst [vmem:[%s2444_s10 + $0xe8] sm:$0xff] %v1386_v25 }
 0x1fc   : > { %1983 = shalt.err (!%p1980_p5)
}
 0x1fd   : > { %s1984_s8 = scalar_lea.hbm %s2823_s21, 4096  ;;  %s1988_s24 = scalar_lea.hbm %s2879_s3, 8192 }
 0x1fe   : > { %p1985_p9 = scmp.ne.s32.totalorder %s2823_s21, %s1984_s8  ;;  %p1989_p3 = scmp.lt.u32.totalorder %s2823_s21, %s2879_s3 }
 0x1ff   : > { %p1990_p7 = scmp.lt.u32.totalorder %s1988_s24, %s1984_s8  ;;  %p1992_p4 = scmp.lt.u32.totalorder %s1984_s8, %s2823_s21 }
 0x200   : > { %p1986_p1 = pnand %p1985_p9, %p2184_p10 }
 0x201   : > { %p1991_p13 = por %p1990_p7, %p1989_p3 }
 0x202   : > { %p1987_p2 = pneg %p1986_p1 }
 0x203   : > { %p1993_p6 = por %p1992_p4, %p1991_p13 }
 0x205   : > { %p1994_p8 = pnand %p1993_p6, %p1987_p2 }
 0x207   : > { %1997 = shalt.err (!%p1994_p8)
}
 0x208   : > { %s2063_s9 = smov 128   ;;  %s2064_s18 = smov 8  }
 0x209   : > { %1688 = dma.vmem_to_hbm [thread:$0]  (%p2184_p10), %s2825_s19, 4096, %s2823_s21, %s1422_s15, %s2063_s9, %s2063_s9, %s2064_s18  }
 0x20a PF: > { %s1451_s25 = sand.u32 1, %s2036_s12   ;;  %p2903_p12 = scmp.ne.s32.totalorder %s2887_s23, 0 }
 0x20b   : > { %p2904_p11 = scmp.ge.s32.totalorder %s2056_s17, 2  ;;  %s1452_s26 = scalar_lea.sflag [#allocation5], %s1451_s25 }
 0x20d   : > { %p1699_p0 = pnand %p2904_p11, %p2903_p12 }
 0x20f   : > { %2031 = dma.done.wait (!%p1699_p0), %s1452_s26, 4096  }
 0x210   : > { %2033 = vsyncadd (!%p1699_p0), %s1452_s26, 4294963200  ;;  %s20_s17 = sadd.s32 1, %s2056_s17   ;;  %s2905_s12 = smov %s2040_s13 }
 0x211   : > { %p17_p5 = scmp.ge.s32.totalorder %s20_s17, 4   ;;  %s2906_s13 = smov %s2044_s14 }
 0x212   : > { %s2907_s14 = smov %s2193_s5  ;;  %s2908_s15 = smov %s2052_s16 }
 0x213   : > { %s2909_s16 = smov %s2911_s28  ;;  %19 = sbr.rel (!%p17_p5) target bundleno = 7 (0x7), region = 93 }
 0x21a   :  { %1457 = vsyncpa [#allocation4], 1 }
 0x21b   :  { %1459 = vsyncpa [#allocation4 + $0x1], 1 }
 0x21c   :  { %1460 = vsyncpa [#allocation7], 1 }
 0x21d   :  { %1461 = vsyncpa [#allocation5], 1 }
 0x21e   :  { %1463 = vsyncpa [#allocation5 + $0x1], 1 }

</bundles_post_ra>
